<compile_context>
chip_gen: v7x
topology: tpu7x:2x2x1
jax: 0.10.0
libtpu: 0.0.40
codegen_flags: <defaults>
</compile_context>

<pallas_src>
import functools
import math

import jax
import jax.numpy as jnp
from jax import lax
from jax.experimental import pallas as pl
from jax.experimental.pallas import tpu as pltpu

_NORM_EPS = 1e-12  # F.normalize default eps
_LANE = 128
_SUBLANE = 8


def _round_up(x, m):
    return (x + m - 1) // m * m


def _memory_unit_kernel(f_ref, nm_t_ref, mem_ref, mf_ref, w_ref, *,
                        threshold, epsilon, m_real, matmul_dtype):
    """One row-tile of MemoryUnit.forward.

    f_ref   : (TILE, Cp)  flattened feature rows (zero-padded channels)
    nm_t_ref: (Cp, Mp)    L2-normalized memory, pre-transposed (grid-invariant)
    mem_ref : (Mp, Cp)    raw memory bank (grid-invariant)
    mf_ref  : (TILE, Cp)  memory_feature output
    w_ref   : (TILE, Mp)  addressing-weight output
    """
    f = f_ref[...].astype(jnp.float32)

    # F.normalize(feature, p=2, dim=1): x / max(||x||, eps) == x * rsqrt(max(||x||^2, eps^2))
    ss = jnp.sum(f * f, axis=1, keepdims=True)
    nf = f * lax.rsqrt(jnp.maximum(ss, _NORM_EPS * _NORM_EPS))

    # weight = F.linear(nf, nm) == nf @ nm.T ; nm.T is precomputed in the wrapper,
    # so there is no in-kernel transpose and no per-tile memory normalization.
    logits = jnp.dot(nf.astype(matmul_dtype), nm_t_ref[...],
                     preferred_element_type=jnp.float32)

    # Padded memory columns must get exactly zero softmax mass.
    m_pad = logits.shape[1]
    if m_real != m_pad:
        col = lax.broadcasted_iota(jnp.int32, logits.shape, 1)
        logits = jnp.where(col < m_real, logits, -1e30)

    # softmax over the memory axis
    logits = logits - jnp.max(logits, axis=1, keepdims=True)
    e = jnp.exp(logits)
    w = e * pl.reciprocal(jnp.sum(e, axis=1, keepdims=True), approx=True)

    # hard_shrink: relu(w - t) * w / (|w - t| + eps)
    d = w - threshold
    w = jnp.maximum(d, 0.0) * w * pl.reciprocal(jnp.abs(d) + epsilon, approx=True)

    # F.normalize(w, p=1, dim=1)
    l1 = jnp.sum(jnp.abs(w), axis=1, keepdims=True)
    w = w * pl.reciprocal(jnp.maximum(l1, _NORM_EPS), approx=True)

    # memory_feature = w @ memory
    mf = jnp.dot(w, mem_ref[...], preferred_element_type=jnp.float32)

    mf_ref[...] = mf.astype(mf_ref.dtype)
    w_ref[...] = w.astype(w_ref.dtype)


def memory_unit_forward(feature, memory, *, threshold, epsilon,
                        row_tile=256, matmul_dtype=jnp.bfloat16):
    """Pallas implementation of MemoryUnit.forward.

    Returns (memory_feature reshaped to feature.shape, weight of shape (rows, M)).
    """
    orig_shape = feature.shape
    m_real, channel = memory.shape

    flat = feature.reshape(-1, channel).astype(jnp.float32)  # matches torch .view(-1, C)
    rows = flat.shape[0]

    c_pad = _round_up(channel, _LANE)
    m_pad = _round_up(m_real, _LANE)

    # --- grid-invariant memory prep, hoisted out of the kernel ---
    #   nm   = F.normalize(memory, p=2, dim=1)
    #   nm_t = nm pre-transposed to (C, M) in the matmul dtype
    mem32 = memory.astype(jnp.float32)
    nm = mem32 / jnp.maximum(jnp.linalg.norm(mem32, axis=1, keepdims=True), _NORM_EPS)
    nm_t = jnp.pad(nm.T.astype(matmul_dtype),
                   ((0, c_pad - channel), (0, m_pad - m_real)))
    mem_padded = jnp.pad(mem32, ((0, m_pad - m_real), (0, c_pad - channel)))

    # --- row tiling: large tiles (per-step overhead), >=2 grid steps when
    # possible (v7x megacore), ragged tail zero-padded and sliced off. ---
    rows8 = _round_up(rows, _SUBLANE)
    tile = min(row_tile, rows8)
    if tile == rows8 and rows8 >= 2 * _SUBLANE:
        tile = _round_up(rows8 // 2, _SUBLANE)
    rows_pad = _round_up(rows, tile)
    f_padded = jnp.pad(flat, ((0, rows_pad - rows), (0, c_pad - channel)))

    grid = (rows_pad // tile,)
    kernel = functools.partial(
        _memory_unit_kernel,
        threshold=float(threshold), epsilon=float(epsilon),
        m_real=m_real, matmul_dtype=matmul_dtype)

    mf, w = pl.pallas_call(
        kernel,
        out_shape=(
            jax.ShapeDtypeStruct((rows_pad, c_pad), jnp.float32),
            jax.ShapeDtypeStruct((rows_pad, m_pad), jnp.float32),
        ),
        grid=grid,
        in_specs=[
            pl.BlockSpec((tile, c_pad), lambda i: (i, 0)),
            pl.BlockSpec((c_pad, m_pad), lambda i: (0, 0)),   # grid-invariant
            pl.BlockSpec((m_pad, c_pad), lambda i: (0, 0)),   # grid-invariant
        ],
        out_specs=(
            pl.BlockSpec((tile, c_pad), lambda i: (i, 0)),
            pl.BlockSpec((tile, m_pad), lambda i: (i, 0)),
        ),
        compiler_params=pltpu.CompilerParams(
            dimension_semantics=("parallel",),
            vmem_limit_bytes=32 * 1024 * 1024,
        ),
    )(f_padded, nm_t, mem_padded)

    mf = mf[:rows, :channel].reshape(orig_shape)
    w = w[:rows, :m_real]
    return mf, w


class MemoryModulePallas:
    """JAX/Pallas port of MemoryModule."""

    def __init__(self, memory_size, channels, key, threshold=0.0025, epsilon=1e-12,
                 row_tile=256, matmul_dtype=jnp.bfloat16):
        self.memory_size = memory_size
        self.channels = list(channels)
        self.threshold = threshold
        self.epsilon = epsilon
        self.row_tile = row_tile
        self.matmul_dtype = matmul_dtype  # bf16 targets v6e/v7x MXU; use jnp.float32 for exactness
        # deterministic init: uniform(-stdv, stdv), stdv = 1/sqrt(channel)
        keys = jax.random.split(key, len(self.channels))
        self.memories = []
        for k, c in zip(keys, self.channels):
            stdv = 1.0 / math.sqrt(c)
            self.memories.append(
                jax.random.uniform(
                    k, (memory_size, c), jnp.float32, minval=-stdv, maxval=stdv
                )
            )

    def __call__(self, features):
        concat_features = []
        memory_weights = []
        for memory, feature in zip(self.memories, features):
            mf, w = memory_unit_forward(
                feature, memory, threshold=self.threshold, epsilon=self.epsilon,
                row_tile=self.row_tile, matmul_dtype=self.matmul_dtype)
            # TODO(synk): the channel concat is a separate HBM pass; fusing it into the
            # kernel's out_spec would need an NCHW-offset output layout.
            concat_features.append(jnp.concatenate([mf, feature], axis=1))
            memory_weights.append(w)
        return concat_features, memory_weights


def _reference_memory_unit(feature, memory, threshold, epsilon):
    """Pure-JAX f32 reference mirroring the PyTorch code, for verification."""
    c = memory.shape[1]
    f = feature.reshape(-1, c).astype(jnp.float32)
    nf = f / jnp.maximum(jnp.linalg.norm(f, axis=1, keepdims=True), _NORM_EPS)
    nm = memory / jnp.maximum(
        jnp.linalg.norm(memory, axis=1, keepdims=True), _NORM_EPS
    )
    w = nf @ nm.T
    w = jax.nn.softmax(w, axis=1)
    d = w - threshold
    w = jnp.maximum(d, 0.0) * w / (jnp.abs(d) + epsilon)
    w = w / jnp.maximum(jnp.sum(jnp.abs(w), axis=1, keepdims=True), _NORM_EPS)
    mf = (w @ memory).reshape(feature.shape)
    return mf, w


if __name__ == "__main__":
    key = jax.random.PRNGKey(0)
    k_mod, k_f1, k_f2 = jax.random.split(key, 3)

    memory_size = 16
    channels = [4, 8]

    # small NCHW features, one per channel entry
    f1 = jax.random.normal(k_f1, (2, 4, 16, 16), jnp.float32)
    f2 = jax.random.normal(k_f2, (2, 8, 8, 8), jnp.float32)
    features = [f1, f2]

    # --- exact-path run (f32 cosine-sim matmul): tight check vs the PyTorch math.
    # Tolerance covers the approx EUP reciprocals used for the softmax/shrink/L1
    # denominators (well under 1e-3 relative in practice).
    module_f32 = MemoryModulePallas(memory_size, channels, k_mod, matmul_dtype=jnp.float32)
    cf_f32, w_f32 = module_f32(features)
    jax.block_until_ready(cf_f32)
    jax.block_until_ready(w_f32)
    for feat, mem, cf, w in zip(features, module_f32.memories, cf_f32, w_f32):
        mf_ref, w_ref = _reference_memory_unit(feat, mem, module_f32.threshold, module_f32.epsilon)
        cf_ref = jnp.concatenate([mf_ref, feat], axis=1)
        assert cf.shape == (feat.shape[0], 2 * feat.shape[1]) + feat.shape[2:]
        assert w.shape == w_ref.shape
        assert bool(jnp.allclose(cf, cf_ref, rtol=2e-2, atol=1e-3)), \
            float(jnp.max(jnp.abs(cf - cf_ref)))
        assert bool(jnp.allclose(w, w_ref, rtol=2e-2, atol=1e-3)), \
            float(jnp.max(jnp.abs(w - w_ref)))

    # --- perf-default run (bf16 cosine-sim matmul, per v6e/v7x MXU feedback):
    # looser check vs the f32 reference (bf16 logit rounding).
    module = MemoryModulePallas(memory_size, channels, k_mod)  # matmul_dtype=bf16
    concat_features, memory_weights = module(features)
    jax.block_until_ready(concat_features)
    jax.block_until_ready(memory_weights)
    for feat, mem, cf, w in zip(features, module.memories, concat_features, memory_weights):
        mf_ref, w_ref = _reference_memory_unit(feat, mem, module.threshold, module.epsilon)
        cf_ref = jnp.concatenate([mf_ref, feat], axis=1)
        assert cf.shape == cf_ref.shape and w.shape == w_ref.shape
        assert bool(jnp.allclose(w, w_ref, rtol=5e-2, atol=1e-3)), \
            float(jnp.max(jnp.abs(w - w_ref)))
        assert float(jnp.max(jnp.abs(cf - cf_ref))) < 2e-2

    print("KERNEL_OK")
</pallas_src>

<mosaic_0001>
module attributes {stable_mosaic.version = 11 : i64} {
  func.func @_memory_unit_kernel(%arg0: i32, %arg1: memref<256x128xf32, #tpu.memory_space<vmem>>, %arg2: memref<128x128xf32, #tpu.memory_space<vmem>>, %arg3: memref<128x128xf32, #tpu.memory_space<vmem>>, %arg4: memref<256x128xf32, #tpu.memory_space<vmem>>, %arg5: memref<256x128xf32, #tpu.memory_space<vmem>>) attributes {dimension_semantics = [#tpu.dimension_semantics<parallel>], iteration_bounds = array<i64: 2>, scalar_prefetch = 0 : i64, scratch_operands = 0 : i64, tpu.core_type = #tpu.core_type<tc>, window_params = [{transform_indices = @transform_0, window_bounds = array<i64: 256, 128>}, {pipeline_mode = #tpu.pipeline_mode<synchronous>, transform_indices = @transform_1, window_bounds = array<i64: 128, 128>}, {pipeline_mode = #tpu.pipeline_mode<synchronous>, transform_indices = @transform_2, window_bounds = array<i64: 128, 128>}, {transform_indices = @transform_3, window_bounds = array<i64: 256, 128>}, {transform_indices = @transform_4, window_bounds = array<i64: 256, 128>}]} {
    %c0 = arith.constant 0 : index
    %c0_0 = arith.constant 0 : index
    %0 = vector.load %arg1[%c0, %c0_0] : memref<256x128xf32, #tpu.memory_space<vmem>>, vector<256x128xf32>
    %1 = arith.mulf %0, %0 : vector<256x128xf32>
    %cst = arith.constant dense<0.000000e+00> : vector<256xf32>
    %2 = vector.multi_reduction <add>, %1, %cst [1] : vector<256x128xf32> to vector<256xf32>
    %3 = vector.shape_cast %2 : vector<256xf32> to vector<256x1xf32>
    %cst_1 = arith.constant 1.000000e-24 : f32
    %4 = vector.broadcast %cst_1 : f32 to vector<256x1xf32>
    %5 = arith.maximumf %3, %4 : vector<256x1xf32>
    %6 = math.rsqrt %5 : vector<256x1xf32>
    %7 = vector.broadcast %6 : vector<256x1xf32> to vector<256x128xf32>
    %8 = arith.mulf %0, %7 : vector<256x128xf32>
    %c0_2 = arith.constant 0 : index
    %c0_3 = arith.constant 0 : index
    %9 = vector.load %arg2[%c0_2, %c0_3] : memref<128x128xf32, #tpu.memory_space<vmem>>, vector<128x128xf32>
    %cst_4 = arith.constant dense<0.000000e+00> : vector<256x128xf32>
    %10 = tpu.matmul %8, %9, %cst_4 {dimension_numbers = #tpu.dot_dimension_numbers<[1], [0], [0], [1], [0, 0, 1, 1], [], []>} : vector<256x128xf32>, vector<128x128xf32>, vector<256x128xf32> -> vector<256x128xf32>
    %11 = tpu.iota {dimensions = array<i32: 1>} : vector<256x128xi32>
    %c16_i32 = arith.constant 16 : i32
    %12 = vector.broadcast %c16_i32 : i32 to vector<256x128xi32>
    %13 = arith.cmpi slt, %11, %12 : vector<256x128xi32>
    %cst_5 = arith.constant -1.000000e+30 : f32
    %14 = vector.broadcast %cst_5 : f32 to vector<256x128xf32>
    %15 = arith.select %13, %10, %14 : vector<256x128xi1>, vector<256x128xf32>
    %cst_6 = arith.constant dense<0xFF800000> : vector<256xf32>
    %16 = vector.multi_reduction <maximumf>, %15, %cst_6 [1] : vector<256x128xf32> to vector<256xf32>
    %17 = vector.shape_cast %16 : vector<256xf32> to vector<256x1xf32>
    %18 = vector.broadcast %17 : vector<256x1xf32> to vector<256x128xf32>
    %19 = arith.subf %15, %18 : vector<256x128xf32>
    %20 = math.exp %19 : vector<256x128xf32>
    %cst_7 = arith.constant dense<0.000000e+00> : vector<256xf32>
    %21 = vector.multi_reduction <add>, %20, %cst_7 [1] : vector<256x128xf32> to vector<256xf32>
    %22 = vector.shape_cast %21 : vector<256xf32> to vector<256x1xf32>
    %23 = tpu.reciprocal %22 {approx = true} : vector<256x1xf32> -> vector<256x1xf32>
    %24 = vector.broadcast %23 : vector<256x1xf32> to vector<256x128xf32>
    %25 = arith.mulf %20, %24 : vector<256x128xf32>
    %cst_8 = arith.constant 2.500000e-03 : f32
    %26 = vector.broadcast %cst_8 : f32 to vector<256x128xf32>
    %27 = arith.subf %25, %26 : vector<256x128xf32>
    %cst_9 = arith.constant 0.000000e+00 : f32
    %28 = vector.broadcast %cst_9 : f32 to vector<256x128xf32>
    %29 = arith.maximumf %27, %28 : vector<256x128xf32>
    %30 = arith.mulf %29, %25 : vector<256x128xf32>
    %31 = math.absf %27 : vector<256x128xf32>
    %cst_10 = arith.constant 9.99999996E-13 : f32
    %32 = vector.broadcast %cst_10 : f32 to vector<256x128xf32>
    %33 = arith.addf %31, %32 : vector<256x128xf32>
    %34 = tpu.reciprocal %33 {approx = true} : vector<256x128xf32> -> vector<256x128xf32>
    %35 = arith.mulf %30, %34 : vector<256x128xf32>
    %36 = math.absf %35 : vector<256x128xf32>
    %cst_11 = arith.constant dense<0.000000e+00> : vector<256xf32>
    %37 = vector.multi_reduction <add>, %36, %cst_11 [1] : vector<256x128xf32> to vector<256xf32>
    %38 = vector.shape_cast %37 : vector<256xf32> to vector<256x1xf32>
    %cst_12 = arith.constant 9.99999996E-13 : f32
    %39 = vector.broadcast %cst_12 : f32 to vector<256x1xf32>
    %40 = arith.maximumf %38, %39 : vector<256x1xf32>
    %41 = tpu.reciprocal %40 {approx = true} : vector<256x1xf32> -> vector<256x1xf32>
    %42 = vector.broadcast %41 : vector<256x1xf32> to vector<256x128xf32>
    %43 = arith.mulf %35, %42 : vector<256x128xf32>
    %c0_13 = arith.constant 0 : index
    %c0_14 = arith.constant 0 : index
    %44 = vector.load %arg3[%c0_13, %c0_14] : memref<128x128xf32, #tpu.memory_space<vmem>>, vector<128x128xf32>
    %cst_15 = arith.constant dense<0.000000e+00> : vector<256x128xf32>
    %45 = tpu.matmul %43, %44, %cst_15 {dimension_numbers = #tpu.dot_dimension_numbers<[1], [0], [0], [1], [0, 0, 1, 1], [], []>} : vector<256x128xf32>, vector<128x128xf32>, vector<256x128xf32> -> vector<256x128xf32>
    %c0_16 = arith.constant 0 : index
    %c0_17 = arith.constant 0 : index
    %46 = vector.load %arg4[%c0_16, %c0_17] : memref<256x128xf32, #tpu.memory_space<vmem>>, vector<256x128xf32>
    tpu.vector_store %arg4[%c0_16, %c0_17], %45 {strides = array<i32>} : memref<256x128xf32, #tpu.memory_space<vmem>>, vector<256x128xf32>,
    %c0_18 = arith.constant 0 : index
    %c0_19 = arith.constant 0 : index
    %47 = vector.load %arg5[%c0_18, %c0_19] : memref<256x128xf32, #tpu.memory_space<vmem>>, vector<256x128xf32>
    tpu.vector_store %arg5[%c0_18, %c0_19], %43 {strides = array<i32>} : memref<256x128xf32, #tpu.memory_space<vmem>>, vector<256x128xf32>,
    return
  }
  func.func @transform_0(%arg0: i32) -> (i32, i32) {
    %c0_i32 = arith.constant 0 : i32
    %c0_i32_0 = arith.constant 0 : i32
    return %arg0, %c0_i32 : i32, i32
  }
  func.func @transform_1(%arg0: i32) -> (i32, i32) {
    %c0_i32 = arith.constant 0 : i32
    %c0_i32_0 = arith.constant 0 : i32
    %c0_i32_1 = arith.constant 0 : i32
    return %c0_i32, %c0_i32_0 : i32, i32
  }
  func.func @transform_2(%arg0: i32) -> (i32, i32) {
    %c0_i32 = arith.constant 0 : i32
    %c0_i32_0 = arith.constant 0 : i32
    %c0_i32_1 = arith.constant 0 : i32
    return %c0_i32, %c0_i32_0 : i32, i32
  }
  func.func @transform_3(%arg0: i32) -> (i32, i32) {
    %c0_i32 = arith.constant 0 : i32
    %c0_i32_0 = arith.constant 0 : i32
    return %arg0, %c0_i32 : i32, i32
  }
  func.func @transform_4(%arg0: i32) -> (i32, i32) {
    %c0_i32 = arith.constant 0 : i32
    %c0_i32_0 = arith.constant 0 : i32
    return %arg0, %c0_i32 : i32, i32
  }
}

</mosaic_0001>

<bundles_post_ra>
// kernel: tpu_custom_call.1
= control target key start
LH: loop header
LB: loop body
LE: loop exit
PB: predicated region body
PF: predicated region fallthrough
CT: control target
= control target key end

     0   :  { %10 = vsyncpa [#allocation3], 0  ;;  %s4140_s0 = inlined_call_operand.hbm [shape: f32[512,128], index: 0, kind: input, shape index: {}]   ;;  %s4141_s1 = inlined_call_operand.hbm [shape: f32[128,128], index: 1, kind: input, shape index: {}]   ;;  %s4142_s2 = inlined_call_operand.hbm [shape: f32[128,128], index: 2, kind: input, shape index: {}]   ;;  %s4143_s3 = inlined_call_operand.hbm [shape: f32[512,128], index: 3, kind: output, shape index: {0}]   ;;  %s4144_s4 = inlined_call_operand.hbm [shape: f32[512,128], index: 4, kind: output, shape index: {1}]  }
   0x1   :  { %12 = vsyncpa [#allocation3 + $0x1], 0 }
   0x2   :  { %13 = vsyncpa [#allocation6], 0 }
   0x3   :  { %14 = vsyncpa [#allocation4], 0 }
   0x4   :  { %16 = vsyncpa [#allocation4 + $0x1], 0 }
   0x5   :  { %17 = vsyncpa [#allocation10], 0 }
   0x6   :  { %19 = vsyncpa [#allocation10 + $0x1], 0  ;;  %s2924_s15 = smov 0   ;;  %s2926_s16 = smov 0  }
   0x7   :  { %s2928_s17 = smov 0   ;;  %s2930_s18 = smov 0  }
   0x8 LB: > { %s2945_s19 = sadd.s32 4294967295, %s2888_s18   ;;  %s1927_s20 = sadd.s32 4294967294, %s2888_s18   ;;  %s2888_s18 = sphi %s2930_s18, %s4164_s18   ;;  %s2884_s17 = sphi %s2928_s17, %s4163_s17   ;;  %s2880_s16 = sphi %s2926_s16, %s4162_s16   ;;  %s2876_s15 = sphi %s2924_s15, %s4161_s15  }
   0x9   : > { %p45_p0 = scmp.ne.s32.totalorder %s2880_s16, %s2876_s15  ;;  %p4145_p1 = scmp.eq.s32.totalorder %s2945_s19, 0 }
   0xa   : > { %p117_p3 = scmp.eq.s32.totalorder %s1927_s20, 1  ;;  %p1928_p5 = scmp.ge.s32.totalorder %s2888_s18, 1 }
   0xb   : > { %p2954_p4 = por %p4145_p1, %p45_p0  ;;  %p150_p7 = scmp.lt.s32.totalorder %s2888_s18, 3 }
   0xc   : > { %p2959_p6 = por %p117_p3, %p45_p0  ;;  %s2890_s24 = smov [#allocation5]  }
   0xd   : > { %s4148_s21 = scalar_select %p2954_p4, 1, 0 }
   0xe   : > { %s4149_s22 = scalar_select %p2959_p6, 1, 0 }
   0xf   : > { %p2964_p8 = pnand %p1928_p5, %p150_p7  ;;  %s162_s25 = sshll.u32 %s2890_s24, 4  ;;  %s2968_s25 = int_to_ptr.vmem [resolvable:$true] %s162_s25 }
  0x10   : > { %s2891_s27 = smov [#allocation7]   ;;  %s2700_s5 = scalar_lea.hbm %s4141_s1, 2048 }
  0x11   : > { %p2318_p9 = pneg %p2964_p8  ;;  %s175_s28 = sshll.u32 %s2891_s27, 4  ;;  %s2979_s28 = int_to_ptr.vmem [resolvable:$true] %s175_s28 }
  0x12   : > { %p2701_p12 = scmp.ne.s32.totalorder %s4141_s1, %s2700_s5  ;;  %p2707_p5 = scmp.lt.u32.totalorder %s2700_s5, %s4141_s1 }
  0x13   : > { %p2975_p11 = pnand %p2318_p9, %p4145_p1 }
  0x15   : > { %p2702_p13 = pneg %p2975_p11 }
  0x17   : > { %p2703_p0 = pnand %p2702_p13, %p2701_p12 }
  0x19   : > { %p2704_p3 = pneg %p2703_p0 }
  0x1b   : > { %p2709_p7 = pnand %p2707_p5, %p2704_p3 }
  0x1d   : > { %2712 = shalt.err (!%p2709_p7)
}
  0x1e   : > { %s2713_s10 = scalar_lea.vmem %s2968_s25, 2048  ;;  %p2721_p2 = scmp.lt.s32.totalorder %s2968_s25, %s2968_s25 }
  0x1f   : > { %p2714_p9 = scmp.ne.s32.totalorder %s2968_s25, %s2713_s10  ;;  %p2722_p12 = scmp.lt.s32.totalorder %s2713_s10, %s2713_s10 }
  0x21   : > { %p2716_p10 = pnand %p2714_p9, %p2702_p13  ;;  %p2723_p0 = por %p2722_p12, %p2721_p2 }
  0x23   : > { %p2717_p1 = pneg %p2716_p10 }
  0x25   : > { %p2724_p6 = pnand %p2723_p0, %p2717_p1 }
  0x27   : > { %2727 = shalt.err (!%p2724_p6)
}
  0x28   : > { %s2892_s11 = smov 128   ;;  %s2893_s12 = smov 8  }
  0x29   : > { %2321 = dma.hbm_to_vmem [thread:$0]  (!%p2975_p11), %s4141_s1, 2048, %s2968_s25, [#allocation6], %s2892_s11, %s2892_s11, %s2893_s12  }
  0x2a   : > { %s2728_s27 = scalar_lea.hbm %s4142_s2, 2048 }
  0x2b   : > { %p2729_p1 = scmp.ne.s32.totalorder %s4142_s2, %s2728_s27  ;;  %p2735_p10 = scmp.lt.u32.totalorder %s2728_s27, %s4142_s2 }
  0x2d   : > { %p2731_p2 = pnand %p2729_p1, %p2702_p13 }
  0x2f   : > { %p2732_p6 = pneg %p2731_p2 }
  0x31   : > { %p2737_p3 = pnand %p2735_p10, %p2732_p6 }
  0x33   : > { %2740 = shalt.err (!%p2737_p3)
}
  0x34   : > { %s2741_s25 = scalar_lea.vmem %s2979_s28, 2048  ;;  %p2749_p12 = scmp.lt.s32.totalorder %s2979_s28, %s2979_s28 }
  0x35   : > { %p2742_p5 = scmp.ne.s32.totalorder %s2979_s28, %s2741_s25  ;;  %p2750_p0 = scmp.lt.s32.totalorder %s2741_s25, %s2741_s25 }
  0x37   : > { %p2744_p7 = pnand %p2742_p5, %p2702_p13  ;;  %p2751_p1 = por %p2750_p0, %p2749_p12 }
  0x39   : > { %p2745_p9 = pneg %p2744_p7 }
  0x3b   : > { %p2752_p2 = pnand %p2751_p1, %p2745_p9 }
  0x3d   : > { %2755 = shalt.err (!%p2752_p2)
}
  0x3e   : > { %2324 = dma.hbm_to_vmem [thread:$0]  (!%p2975_p11), %s4142_s2, 2048, %s2979_s28, [#allocation6], %s2892_s11, %s2892_s11, %s2893_s12  }
  0x3f   : > { %s3040_s26 = sadd.s32 1, %s2888_s18   ;;  %s32_s9 = sadd.s32 1, %s2884_s17 }
  0x40   : > { %s29_s10 = ssub.s32 %s2888_s18, %s3040_s26  ;;  %p39_p13 = scmp.ne.s32.totalorder %s2884_s17, %s2880_s16 }
  0x41   : > { %p30_p6 = scmp.eq.s32.totalorder %s29_s10, 0  ;;  %p40_p10 = scmp.eq.s32.totalorder %s2888_s18, 0 }
  0x42   : > { %p4152_p3 = scmp.eq.s32.totalorder %s2945_s19, 1  ;;  %p2338_p7 = scmp.lt.s32.totalorder %s2888_s18, 2 }
  0x43   : > { %s3056_s14 = scalar_select %p30_p6, %s2884_s17, %s32_s9  }
  0x44   : > { %p3050_p5 = por %p4152_p3, %p39_p13  ;;  %p41_p9 = por %p40_p10, %p39_p13 }
  0x45   : > { %s189_s20 = sand.u32 1, %s2884_s17   ;;  %s1981_s28 = sshll.u32 %s2888_s18, 12 }
  0x46   : > { %s4153_s13 = scalar_select %p3050_p5, 1, 0 }
  0x47   : > { %s1932_s24 = sshll.u32 %s189_s20, 8  ;;  %s3063_s30 = scalar_lea.hbm %s4140_s0, %s1981_s28 }
  0x48   : > { %s193_s5 = scalar_lea.vmem [#allocation2], %s1932_s24  ;;  %p3067_p11 = pnand %p2338_p7, %p41_p9 }
  0x49   : > { %s200_s6 = sshll.u32 %s193_s5, 4  ;;  %s3071_s7 = scalar_lea.sflag [#allocation3], %s189_s20  ;;  %s3065_s6 = int_to_ptr.vmem [resolvable:$true] %s200_s6 }
  0x4a   : > { %s2756_s8 = scalar_lea.hbm %s3063_s30, 4096  ;;  %p2758_p0 = pneg %p3067_p11 }
  0x4b   : > { %p2757_p12 = scmp.ne.s32.totalorder %s3063_s30, %s2756_s8  ;;  %s2761_s24 = scalar_lea.hbm %s4140_s0, 8192 }
  0x4c   : > { %p2762_p13 = scmp.lt.u32.totalorder %s3063_s30, %s4140_s0  ;;  %p2763_p6 = scmp.lt.u32.totalorder %s2761_s24, %s2756_s8 }
  0x4d   : > { %p2759_p1 = pnand %p2758_p0, %p2757_p12  ;;  %p2765_p3 = scmp.lt.u32.totalorder %s2756_s8, %s3063_s30 }
  0x4e   : > { %p2764_p10 = por %p2763_p6, %p2762_p13 }
  0x4f   : > { %p2760_p2 = pneg %p2759_p1 }
  0x50   : > { %p2766_p7 = por %p2765_p3, %p2764_p10 }
  0x52   : > { %p2767_p9 = pnand %p2766_p7, %p2760_p2 }
  0x54   : > { %2770 = shalt.err (!%p2767_p9)
}
  0x55   : > { %s2771_s20 = scalar_lea.vmem %s3065_s6, 4096  ;;  %s2894_s29 = smov [#allocation2]  }
  0x56   : > { %p2772_p12 = scmp.ne.s32.totalorder %s3065_s6, %s2771_s20  ;;  %s2776_s5 = sshll.u32 %s2894_s29, 4  ;;  %s2777_s5 = int_to_ptr.vmem [resolvable:$false] %s2776_s5 }
  0x57   : > { %s2778_s9 = scalar_lea.vmem %s2777_s5, 8192  ;;  %p2779_p4 = scmp.lt.s32.totalorder %s3065_s6, %s2777_s5 }
  0x58   : > { %p2774_p1 = pnand %p2772_p12, %p2758_p0  ;;  %p2780_p13 = scmp.lt.s32.totalorder %s2778_s9, %s2771_s20 }
  0x5a   : > { %p2775_p5 = pneg %p2774_p1  ;;  %p2781_p6 = por %p2780_p13, %p2779_p4 }
  0x5c   : > { %p2782_p10 = pnand %p2781_p6, %p2775_p5 }
  0x5e   : > { %2785 = shalt.err (!%p2782_p10)
}
  0x5f   : > { %2328 = dma.hbm_to_vmem [thread:$0]  (!%p3067_p11), %s3063_s30, 4096, %s3065_s6, %s3071_s7, %s2892_s11, %s2892_s11, %s2893_s12  }
  0x60   : > { %212 = sbr.rel (%p2964_p8) target bundleno = 1273 (0x4f9), region = 32  ;;  %s3105_s8 = sand.u32 (!%p2964_p8), 1, %s2880_s16  }
  0x61   : > { %s3108_s10 = sshll.u32 (!%p2964_p8), %s3105_s8, 8  ;;  %s215_s25 = scalar_lea.sflag (!%p2964_p8), [#allocation3], %s3105_s8 }
  0x62   : > { %s3112_s24 = scalar_lea.vmem (!%p2964_p8), [#allocation2], %s3108_s10  ;;  %p4155_p4 = scmp.ne.s32.totalorder (!%p2964_p8), %s4148_s21, 0 }
  0x67   : > { %2859 = dma.done.wait (%p4155_p4), %s215_s25, 4096  }
  0x68   : > { %2861 = vsyncadd (%p4155_p4), %s215_s25, 4294963200  ;;  %p4156_p5 = scmp.eq.s32.totalorder %s2945_s19, 0 }
  0x6a   : > { %2863 = dma.done.wait (%p4156_p5), [#allocation6], 4096   ;;  %p4157_p8 = pmov %p4156_p5 }
  0x6b   : > { %v3123_v0 = vld [vmem:[%s3112_s24] sm:$0xff]  ;;  %v3126_v1 = vld [vmem:[%s3112_s24 + $0x10] sm:$0xff]  ;;  %v3129_v2 = vld [vmem:[%s3112_s24 + $0x8] sm:$0xff]  ;;  %s3947_s21 = scalar_lea.vmem [#allocation9], %s3108_s10  ;;  %s1982_s23 = sshll.u32 %s2945_s19, 12 }
  0x6c   : > { %2865 = vsyncadd (%p4157_p8), [#allocation6], 4294963200  ;;  %v291_v3 = vmul.f32 %v3123_v0, %v3123_v0  ;;  %v293_v4 = vmul.f32 %v3126_v1, %v3126_v1  ;;  %v3136_v5 = vld [vmem:[%s3112_s24 + $0x18] sm:$0xff]  ;;  %v292_v6 = vmul.f32 %v3129_v2, %v3129_v2  ;;  %v3143_v8 = vld [vmem:[%s3112_s24 + $0x20] sm:$0xff]  ;;  %s4018_s30 = scalar_lea.hbm %s4144_s4, %s1982_s23  ;;  %s1803_s6 = sshll.u32 %s3947_s21, 4  ;;  %s4021_s6 = int_to_ptr.vmem [resolvable:$true] %s1803_s6 }
  0x6d   : > { %v294_v7 = vmul.f32 %v3136_v5, %v3136_v5  ;;  %v3146_v9 = vld [vmem:[%s3112_s24 + $0x28] sm:$0xff]  ;;  %v295_v10 = vmul.f32 %v3143_v8, %v3143_v8  ;;  %v3153_v12 = vld [vmem:[%s3112_s24 + $0x30] sm:$0xff]  ;;  %v3156_v13 = vld [vmem:[%s3112_s24 + $0x38] sm:$0xff]  ;;  %s1774_s7 = scalar_lea.sflag [#allocation10], %s3105_s8  ;;  %s2786_s28 = scalar_lea.vmem %s4021_s6, 4096 }
  0x6e   : > { %323 = vadd.xlane.f32.xlu0 %v291_v3  ;;  %327 = vadd.xlane.f32.xlu1 %v293_v4  ;;  %v296_v11 = vmul.f32 %v3146_v9, %v3146_v9  ;;  %v483_v14 = vld [vmem:[#allocation5] sm:$0xff]  ;;  %v297_v15 = vmul.f32 %v3153_v12, %v3153_v12  ;;  %v298_v16 = vmul.f32 %v3156_v13, %v3156_v13  ;;  %v484_v17 = vld [vmem:[#allocation5 + $0x8] sm:$0xff]  ;;  %v485_v18 = vld [vmem:[#allocation5 + $0x10] sm:$0xff]  ;;  %p2787_p11 = scmp.ne.s32.totalorder %s4021_s6, %s2786_s28  ;;  %p4158_p0 = scmp.ne.s32.totalorder %s4153_s13, 0 }
  0x6f   : > { %v486_v19 = vld [vmem:[#allocation5 + $0x18] sm:$0xff]  ;;  %v3163_v20 = vld [vmem:[%s3112_s24 + $0x40] sm:$0xff]  ;;  %v3166_v21 = vld [vmem:[%s3112_s24 + $0x48] sm:$0xff]  ;;  %v2240_v22 = vpack.c.bf16 %v484_v17, %v483_v14  ;;  %s2895_s27 = smov [#allocation9]  }
  0x70   : > { %v2244_v23 = vpack.c.bf16 %v486_v19, %v485_v18  ;;  %v487_v24 = vld [vmem:[#allocation5 + $0x20] sm:$0xff]  ;;  %v488_v25 = vld [vmem:[#allocation5 + $0x28] sm:$0xff]  ;;  %v299_v26 = vmul.f32 %v3163_v20, %v3163_v20  ;;  %v300_v27 = vmul.f32 %v3166_v21, %v3166_v21  ;;  %v3173_v28 = vld [vmem:[%s3112_s24 + $0x50] sm:$0xff]  ;;  %p2788_p2 = pnand %p2787_p11, %p4158_p0  ;;  %s2790_s20 = sshll.u32 %s2895_s27, 4  ;;  %s2791_s20 = int_to_ptr.vmem [resolvable:$false] %s2790_s20 }
  0x71   : > { %2241 = vmatprep.subr.bf16.mxu0 %v2240_v22  ;;  %v3176_v29 = vld [vmem:[%s3112_s24 + $0x58] sm:$0xff]  ;;  %v2248_v30 = vpack.c.bf16 %v488_v25, %v487_v24  ;;  %v489_v31 = vld [vmem:[#allocation5 + $0x30] sm:$0xff]  ;;  %v301_v33 = vmul.f32 %v3173_v28, %v3173_v28  ;;  %v3183_v35 = vld [vmem:[%s3112_s24 + $0x60] sm:$0xff]  ;;  %s2792_s29 = scalar_lea.vmem %s2791_s20, 8192  ;;  %p2793_p7 = scmp.lt.s32.totalorder %s4021_s6, %s2791_s20 }
  0x72   : > { %325 = vadd.xlane.f32.xlu0 %v292_v6  ;;  %329 = vadd.xlane.f32.xlu1 %v294_v7  ;;  %v490_v32 = vld [vmem:[#allocation5 + $0x38] sm:$0xff]  ;;  %v302_v34 = vmul.f32 %v3176_v29, %v3176_v29  ;;  %v3186_v36 = vld [vmem:[%s3112_s24 + $0x68] sm:$0xff]  ;;  %v491_v38 = vld [vmem:[#allocation5 + $0x40] sm:$0xff]  ;;  %v303_v40 = vmul.f32 %v3183_v35, %v3183_v35  ;;  %p2789_p3 = pneg %p2788_p2  ;;  %p2794_p9 = scmp.lt.s32.totalorder %s2792_s29, %s2786_s28 }
  0x73   : > { %2243 = vmatpush3.bf16.msra.mxu0 %v2240_v22  ;;  %v2252_v37 = vpack.c.bf16 %v490_v32, %v489_v31  ;;  %v492_v39 = vld [vmem:[#allocation5 + $0x48] sm:$0xff]  ;;  %v304_v41 = vmul.f32 %v3186_v36, %v3186_v36  ;;  %v3193_v42 = vld [vmem:[%s3112_s24 + $0x70] sm:$0xff]  ;;  %v3196_v43 = vld [vmem:[%s3112_s24 + $0x78] sm:$0xff] }
  0x74   : > { %2245 = vmatprep.subr.bf16.mxu0 %v2244_v23  ;;  %v2256_v44 = vpack.c.bf16 %v492_v39, %v491_v38  ;;  %v493_v45 = vld [vmem:[#allocation5 + $0x50] sm:$0xff]  ;;  %v494_v46 = vld [vmem:[#allocation5 + $0x58] sm:$0xff]  ;;  %v305_v47 = vmul.f32 %v3193_v42, %v3193_v42  ;;  %v306_v48 = vmul.f32 %v3196_v43, %v3196_v43  ;;  %v3203_v49 = vld [vmem:[%s3112_s24 + $0x80] sm:$0xff]  ;;  %p2795_p12 = por %p2794_p9, %p2793_p7 }
  0x75   : > { %v3206_v50 = vld [vmem:[%s3112_s24 + $0x88] sm:$0xff]  ;;  %v2260_v51 = vpack.c.bf16 %v494_v46, %v493_v45  ;;  %v495_v52 = vld [vmem:[#allocation5 + $0x60] sm:$0xff]  ;;  %v307_v54 = vmul.f32 %v3203_v49, %v3203_v49  ;;  %v3213_v56 = vld [vmem:[%s3112_s24 + $0x90] sm:$0xff] }
  0x76   : > { %331 = vadd.xlane.f32.xlu0 %v295_v10  ;;  %333 = vadd.xlane.f32.xlu1 %v296_v11  ;;  %v496_v53 = vld [vmem:[#allocation5 + $0x68] sm:$0xff]  ;;  %v308_v55 = vmul.f32 %v3206_v50, %v3206_v50  ;;  %v3216_v57 = vld [vmem:[%s3112_s24 + $0x98] sm:$0xff]  ;;  %v497_v59 = vld [vmem:[#allocation5 + $0x70] sm:$0xff]  ;;  %v309_v61 = vmul.f32 %v3213_v56, %v3213_v56  ;;  %p2796_p1 = pnand %p2795_p12, %p2789_p3 }
  0x77   : > { %2247 = vmatpush3.bf16.msra.mxu0 %v2244_v23  ;;  %v2264_v58 = vpack.c.bf16 %v496_v53, %v495_v52  ;;  %v498_v60 = vld [vmem:[#allocation5 + $0x78] sm:$0xff]  ;;  %v310_v62 = vmul.f32 %v3216_v57, %v3216_v57  ;;  %v3223_v63 = vld [vmem:[%s3112_s24 + $0xa0] sm:$0xff]  ;;  %v3226_v3 = vld [vmem:[%s3112_s24 + $0xa8] sm:$0xff] }
  0x78   : > { %2249 = vmatprep.subr.bf16.mxu0 %v2248_v30  ;;  %v2268_v4 = vpack.c.bf16 %v498_v60, %v497_v59  ;;  %v311_v6 = vmul.f32 %v3223_v63, %v3223_v63  ;;  %v312_v7 = vmul.f32 %v3226_v3, %v3226_v3  ;;  %v3233_v10 = vld [vmem:[%s3112_s24 + $0xb0] sm:$0xff]  ;;  %v3236_v11 = vld [vmem:[%s3112_s24 + $0xb8] sm:$0xff]  ;;  %v3246_v17 = vld [vmem:[%s3112_s24 + $0xc8] sm:$0xff] }
  0x79   : > { %v313_v14 = vmul.f32 %v3233_v10, %v3233_v10  ;;  %v316_v19 = vmul.f32 %v3246_v17, %v3246_v17  ;;  %v3253_v22 = vld [vmem:[%s3112_s24 + $0xd0] sm:$0xff]  ;;  %v3256_v23 = vld [vmem:[%s3112_s24 + $0xd8] sm:$0xff] }
  0x7a   : > { %335 = vadd.xlane.f32.xlu0 %v297_v15  ;;  %337 = vadd.xlane.f32.xlu1 %v298_v16  ;;  %v314_v15 = vmul.f32 %v3236_v11, %v3236_v11  ;;  %v3243_v16 = vld [vmem:[%s3112_s24 + $0xc0] sm:$0xff]  ;;  %v317_v24 = vmul.f32 %v3253_v22, %v3253_v22  ;;  %v318_v25 = vmul.f32 %v3256_v23, %v3256_v23  ;;  %v3273_v32 = vld [vmem:[%s3112_s24 + $0xf0] sm:$0xff] }
  0x7b   : > { %2251 = vmatpush3.bf16.msra.mxu0 %v2248_v30  ;;  %v315_v18 = vmul.f32 %v3243_v16, %v3243_v16 }
  0x7c   : > { %2253 = vmatprep.subr.bf16.mxu0 %v2252_v37 }
  0x7e   : > { %339 = vadd.xlane.f32.xlu0 %v299_v26  ;;  %341 = vadd.xlane.f32.xlu1 %v300_v27  ;;  %v3263_v26 = vld [vmem:[%s3112_s24 + $0xe0] sm:$0xff]  ;;  %v3266_v27 = vld [vmem:[%s3112_s24 + $0xe8] sm:$0xff] }
  0x7f   : > { %2255 = vmatpush3.bf16.msra.mxu0 %v2252_v37  ;;  %v319_v30 = vmul.f32 %v3263_v26, %v3263_v26  ;;  %v320_v31 = vmul.f32 %v3266_v27, %v3266_v27 }
  0x80   : > { %2257 = vmatprep.subr.bf16.mxu0 %v2256_v44 }
  0x82   : > { %343 = vadd.xlane.f32.xlu0 %v301_v33  ;;  %345 = vadd.xlane.f32.xlu1 %v302_v34  ;;  %v3276_v33 = vld [vmem:[%s3112_s24 + $0xf8] sm:$0xff]  ;;  %v321_v34 = vmul.f32 %v3273_v32, %v3273_v32 }
  0x83   : > { %2259 = vmatpush3.bf16.msra.mxu0 %v2256_v44  ;;  %v322_v37 = vmul.f32 %v3276_v33, %v3276_v33 }
  0x84   : > { %2261 = vmatprep.subr.bf16.mxu0 %v2260_v51 }
  0x86   : > { %347 = vadd.xlane.f32.xlu0 %v303_v40  ;;  %349 = vadd.xlane.f32.xlu1 %v304_v41 }
  0x87   : > { %2263 = vmatpush3.bf16.msra.mxu0 %v2260_v51 }
  0x88   : > { %2265 = vmatprep.subr.bf16.mxu0 %v2264_v58 }
  0x8a   : > { %351 = vadd.xlane.f32.xlu0 %v305_v47  ;;  %353 = vadd.xlane.f32.xlu1 %v306_v48 }
  0x8b   : > { %2267 = vmatpush3.bf16.msra.mxu0 %v2264_v58 }
  0x8c   : > { %2269 = vmatprep.subr.bf16.mxu0 %v2268_v4 }
  0x8e   : > { %355 = vadd.xlane.f32.xlu0 %v307_v54  ;;  %357 = vadd.xlane.f32.xlu1 %v308_v55 }
  0x8f   : > { %2271 = vmatpush3.bf16.msra.mxu0 %v2268_v4 }
  0x92   : > { %359 = vadd.xlane.f32.xlu0 %v309_v61  ;;  %361 = vadd.xlane.f32.xlu1 %v310_v62 }
  0x96   : > { %363 = vadd.xlane.f32.xlu0 %v311_v6  ;;  %365 = vadd.xlane.f32.xlu1 %v312_v7 }
  0x9a   : > { %367 = vadd.xlane.f32.xlu0 %v313_v14  ;;  %369 = vadd.xlane.f32.xlu1 %v314_v15 }
  0x9e   : > { %371 = vadd.xlane.f32.xlu0 %v315_v18  ;;  %373 = vadd.xlane.f32.xlu1 %v316_v19 }
  0xa2   : > { %375 = vadd.xlane.f32.xlu0 %v317_v24  ;;  %377 = vadd.xlane.f32.xlu1 %v318_v25 }
  0xa6   : > { %379 = vadd.xlane.f32.xlu0 %v319_v30  ;;  %381 = vadd.xlane.f32.xlu1 %v320_v31 }
  0xaa   : > { %383 = vadd.xlane.f32.xlu0 %v321_v34  ;;  %385 = vadd.xlane.f32.xlu1 %v322_v37 }
  0xfb   : > { %v324_v38 = vpop.xlane.xlu0 %323  ;;  %v328_v39 = vpop.xlane.xlu1 %327 }
  0xfc   : > { %v387_v40 = vmax.f32 %v324_v38, 1e-24  ;;  %v389_v41 = vmax.f32 %v328_v39, 1e-24 }
  0xfe   : > { %2380 = vrsqrt.f32 %v387_v40 }
  0xff   : > { %2382 = vrsqrt.f32 %v389_v41  ;;  %v326_v44 = vpop.xlane.xlu0 %325  ;;  %v330_v45 = vpop.xlane.xlu1 %329 }
 0x100   : > { %v388_v46 = vmax.f32 %v326_v44, 1e-24  ;;  %v390_v47 = vmax.f32 %v330_v45, 1e-24 }
 0x102   : > { %2384 = vrsqrt.f32 %v388_v46 }
 0x103   : > { %2386 = vrsqrt.f32 %v390_v47  ;;  %v332_v48 = vpop.xlane.xlu0 %331  ;;  %v334_v51 = vpop.xlane.xlu1 %333 }
 0x104   : > { %v391_v52 = vmax.f32 %v332_v48, 1e-24  ;;  %v392_v53 = vmax.f32 %v334_v51, 1e-24 }
 0x106   : > { %2388 = vrsqrt.f32 %v391_v52 }
 0x107   : > { %2390 = vrsqrt.f32 %v392_v53  ;;  %v336_v54 = vpop.xlane.xlu0 %335  ;;  %v338_v55 = vpop.xlane.xlu1 %337 }
 0x108   : > { %v2381_v58 = vpop.eup %2380  ;;  %v393_v59 = vmax.f32 %v336_v54, 1e-24  ;;  %v394_v60 = vmax.f32 %v338_v55, 1e-24 }
 0x109   : > { %v2383_v61 = vpop.eup %2382  ;;  %v451_v62 = vmul.f32 %v2381_v58, %v3123_v0 }
 0x10a   : > { %2392 = vrsqrt.f32 %v393_v59  ;;  %v453_v18 = vmul.f32 %v2383_v61, %v3126_v1 }
 0x10b   : > { %2394 = vrsqrt.f32 %v394_v60  ;;  %2112 = vmatprep.mubr.f32.mxu0 %v451_v62  ;;  %v340_v4 = vpop.xlane.xlu0 %339  ;;  %v342_v6 = vpop.xlane.xlu1 %341 }
 0x10c   : > { %v2385_v7 = vpop.eup %2384  ;;  %v395_v14 = vmax.f32 %v340_v4, 1e-24  ;;  %v396_v15 = vmax.f32 %v342_v6, 1e-24 }
 0x10d   : > { %v2387_v19 = vpop.eup %2386  ;;  %v452_v24 = vmul.f32 %v2385_v7, %v3129_v2 }
 0x10e   : > { %2396 = vrsqrt.f32 %v395_v14  ;;  %v454_v0 = vmul.f32 %v2387_v19, %v3136_v5 }
 0x10f   : > { %2398 = vrsqrt.f32 %v396_v15  ;;  %2113 = vmatmul.mubr.f32.vlgmr.msra.gmra.mrb[0].mxu0 %v452_v24  ;;  %v344_v25 = vpop.xlane.xlu0 %343  ;;  %v346_v30 = vpop.xlane.xlu1 %345 }
 0x110   : > { %v2389_v31 = vpop.eup %2388  ;;  %2115 = vmatprep.mubr.f32.mxu0 %v453_v18  ;;  %v397_v34 = vmax.f32 %v344_v25, 1e-24  ;;  %v398_v37 = vmax.f32 %v346_v30, 1e-24 }
 0x111   : > { %v2391_v38 = vpop.eup %2390  ;;  %v455_v39 = vmul.f32 %v2389_v31, %v3143_v8 }
 0x112   : > { %2400 = vrsqrt.f32 %v397_v34  ;;  %v456_v2 = vmul.f32 %v2391_v38, %v3146_v9 }
 0x113   : > { %2402 = vrsqrt.f32 %v398_v37  ;;  %2116 = vmatmul.mubr.f32.gmra.mrb[2].mxu0 %v454_v0  ;;  %v348_v1 = vpop.xlane.xlu0 %347  ;;  %v350_v40 = vpop.xlane.xlu1 %349 }
 0x114   : > { %v2393_v41 = vpop.eup %2392  ;;  %2118 = vmatprep.mubr.f32.mxu0 %v455_v39  ;;  %v399_v44 = vmax.f32 %v348_v1, 1e-24  ;;  %v400_v45 = vmax.f32 %v350_v40, 1e-24 }
 0x115   : > { %v2395_v46 = vpop.eup %2394  ;;  %v457_v5 = vmul.f32 %v2393_v41, %v3153_v12 }
 0x116   : > { %2404 = vrsqrt.f32 %v399_v44  ;;  %v458_v8 = vmul.f32 %v2395_v46, %v3156_v13 }
 0x117   : > { %2406 = vrsqrt.f32 %v400_v45  ;;  %2119 = vmatmul.mubr.f32.gmra.mrb[4].mxu0 %v456_v2  ;;  %v352_v47 = vpop.xlane.xlu0 %351  ;;  %v354_v48 = vpop.xlane.xlu1 %353 }
 0x118   : > { %v2397_v51 = vpop.eup %2396  ;;  %2121 = vmatprep.mubr.f32.mxu0 %v457_v5  ;;  %v401_v52 = vmax.f32 %v352_v47, 1e-24  ;;  %v402_v53 = vmax.f32 %v354_v48, 1e-24 }
 0x119   : > { %v2399_v54 = vpop.eup %2398  ;;  %v459_v9 = vmul.f32 %v2397_v51, %v3163_v20 }
 0x11a   : > { %2408 = vrsqrt.f32 %v401_v52  ;;  %v460_v12 = vmul.f32 %v2399_v54, %v3166_v21 }
 0x11b   : > { %2410 = vrsqrt.f32 %v402_v53  ;;  %2122 = vmatmul.mubr.f32.gmra.mrb[6].mxu0 %v458_v8  ;;  %v356_v55 = vpop.xlane.xlu0 %355  ;;  %v358_v58 = vpop.xlane.xlu1 %357 }
 0x11c   : > { %v2401_v59 = vpop.eup %2400  ;;  %2124 = vmatprep.mubr.f32.mxu0 %v459_v9  ;;  %v403_v60 = vmax.f32 %v356_v55, 1e-24  ;;  %v404_v61 = vmax.f32 %v358_v58, 1e-24 }
 0x11d   : > { %v2403_v62 = vpop.eup %2402  ;;  %v461_v13 = vmul.f32 %v2401_v59, %v3173_v28 }
 0x11e   : > { %2412 = vrsqrt.f32 %v403_v60  ;;  %v462_v20 = vmul.f32 %v2403_v62, %v3176_v29 }
 0x11f   : > { %2414 = vrsqrt.f32 %v404_v61  ;;  %2125 = vmatmul.mubr.f32.gmra.mrb[8].mxu0 %v460_v12  ;;  %v360_v4 = vpop.xlane.xlu0 %359  ;;  %v362_v6 = vpop.xlane.xlu1 %361 }
 0x120   : > { %v2405_v7 = vpop.eup %2404  ;;  %2127 = vmatprep.mubr.f32.mxu0 %v461_v13  ;;  %v405_v14 = vmax.f32 %v360_v4, 1e-24  ;;  %v406_v15 = vmax.f32 %v362_v6, 1e-24 }
 0x121   : > { %v2407_v18 = vpop.eup %2406  ;;  %v463_v21 = vmul.f32 %v2405_v7, %v3183_v35 }
 0x122   : > { %2416 = vrsqrt.f32 %v405_v14  ;;  %v464_v28 = vmul.f32 %v2407_v18, %v3186_v36 }
 0x123   : > { %2418 = vrsqrt.f32 %v406_v15  ;;  %2128 = vmatmul.mubr.f32.gmra.mrb[10].mxu0 %v462_v20  ;;  %v364_v19 = vpop.xlane.xlu0 %363  ;;  %v366_v24 = vpop.xlane.xlu1 %365 }
 0x124   : > { %v2409_v25 = vpop.eup %2408  ;;  %2130 = vmatprep.mubr.f32.mxu0 %v463_v21  ;;  %v407_v30 = vmax.f32 %v364_v19, 1e-24  ;;  %v408_v0 = vmax.f32 %v366_v24, 1e-24 }
 0x125   : > { %v2411_v31 = vpop.eup %2410  ;;  %v465_v29 = vmul.f32 %v2409_v25, %v3193_v42 }
 0x126   : > { %2420 = vrsqrt.f32 %v407_v30  ;;  %v466_v35 = vmul.f32 %v2411_v31, %v3196_v43 }
 0x127   : > { %2422 = vrsqrt.f32 %v408_v0  ;;  %2131 = vmatmul.mubr.f32.gmra.mrb[12].mxu0 %v464_v28  ;;  %v368_v34 = vpop.xlane.xlu0 %367  ;;  %v370_v37 = vpop.xlane.xlu1 %369 }
 0x128   : > { %v2413_v38 = vpop.eup %2412  ;;  %2133 = vmatprep.mubr.f32.mxu0 %v465_v29  ;;  %v409_v39 = vmax.f32 %v368_v34, 1e-24  ;;  %v410_v1 = vmax.f32 %v370_v37, 1e-24 }
 0x129   : > { %v2415_v40 = vpop.eup %2414  ;;  %v467_v36 = vmul.f32 %v2413_v38, %v3203_v49 }
 0x12a   : > { %2424 = vrsqrt.f32 %v409_v39  ;;  %v468_v42 = vmul.f32 %v2415_v40, %v3206_v50 }
 0x12b   : > { %2426 = vrsqrt.f32 %v410_v1  ;;  %2134 = vmatmul.mubr.f32.gmra.mrb[14].mxu0 %v466_v35  ;;  %v372_v2 = vpop.xlane.xlu0 %371  ;;  %v374_v41 = vpop.xlane.xlu1 %373 }
 0x12c   : > { %v2417_v44 = vpop.eup %2416  ;;  %2136 = vmatprep.mubr.f32.mxu0 %v467_v36  ;;  %v411_v45 = vmax.f32 %v372_v2, 1e-24  ;;  %v412_v46 = vmax.f32 %v374_v41, 1e-24 }
 0x12d   : > { %v2419_v5 = vpop.eup %2418  ;;  %v469_v43 = vmul.f32 %v2417_v44, %v3213_v56 }
 0x12e   : > { %2428 = vrsqrt.f32 %v411_v45  ;;  %v470_v49 = vmul.f32 %v2419_v5, %v3216_v57 }
 0x12f   : > { %2430 = vrsqrt.f32 %v412_v46  ;;  %2137 = vmatmul.mubr.f32.gmra.mrb[16].mxu0 %v468_v42  ;;  %v376_v47 = vpop.xlane.xlu0 %375  ;;  %v378_v48 = vpop.xlane.xlu1 %377 }
 0x130   : > { %v2421_v8 = vpop.eup %2420  ;;  %2139 = vmatprep.mubr.f32.mxu0 %v469_v43  ;;  %v413_v51 = vmax.f32 %v376_v47, 1e-24  ;;  %v414_v52 = vmax.f32 %v378_v48, 1e-24 }
 0x131   : > { %v2423_v53 = vpop.eup %2422  ;;  %v471_v50 = vmul.f32 %v2421_v8, %v3223_v63 }
 0x132   : > { %2432 = vrsqrt.f32 %v413_v51  ;;  %v472_v56 = vmul.f32 %v2423_v53, %v3226_v3 }
 0x133   : > { %2434 = vrsqrt.f32 %v414_v52  ;;  %2140 = vmatmul.mubr.f32.gmra.mrb[18].mxu0 %v470_v49  ;;  %v380_v54 = vpop.xlane.xlu0 %379  ;;  %v382_v9 = vpop.xlane.xlu1 %381 }
 0x134   : > { %v2425_v55 = vpop.eup %2424  ;;  %2142 = vmatprep.mubr.f32.mxu0 %v471_v50  ;;  %v415_v58 = vmax.f32 %v380_v54, 1e-24  ;;  %v416_v12 = vmax.f32 %v382_v9, 1e-24 }
 0x135   : > { %v2427_v59 = vpop.eup %2426  ;;  %v473_v57 = vmul.f32 %v2425_v55, %v3233_v10 }
 0x136   : > { %2436 = vrsqrt.f32 %v415_v58  ;;  %v474_v63 = vmul.f32 %v2427_v59, %v3236_v11 }
 0x137   : > { %2438 = vrsqrt.f32 %v416_v12  ;;  %2143 = vmatmul.mubr.f32.gmra.mrb[20].mxu0 %v472_v56  ;;  %v384_v60 = vpop.xlane.xlu0 %383  ;;  %v386_v61 = vpop.xlane.xlu1 %385 }
 0x138   : > { %v2429_v62 = vpop.eup %2428  ;;  %2145 = vmatprep.mubr.f32.mxu0 %v473_v57  ;;  %v417_v13 = vmax.f32 %v384_v60, 1e-24  ;;  %v418_v4 = vmax.f32 %v386_v61, 1e-24 }
 0x139   : > { %v2431_v6 = vpop.eup %2430  ;;  %v475_v3 = vmul.f32 %v2429_v62, %v3243_v16 }
 0x13a   : > { %2440 = vrsqrt.f32 %v417_v13  ;;  %v476_v20 = vmul.f32 %v2431_v6, %v3246_v17 }
 0x13b   : > { %2442 = vrsqrt.f32 %v418_v4  ;;  %2146 = vmatmul.mubr.f32.gmra.mrb[22].mxu0 %v474_v63 }
 0x13c   : > { %v2433_v10 = vpop.eup %2432  ;;  %2148 = vmatprep.mubr.f32.mxu0 %v475_v3 }
 0x13d   : > { %v2435_v7 = vpop.eup %2434  ;;  %v477_v14 = vmul.f32 %v2433_v10, %v3253_v22  ;;  %v724_v22 = vlaneseq }
 0x13e   : > { %v478_v11 = vmul.f32 %v2435_v7, %v3256_v23 }
 0x13f   : > { %2149 = vmatmul.mubr.f32.gmra.mrb[24].mxu0 %v476_v20  ;;  %v3314_v23 = vand.u32 127, %v724_v22 }
 0x140   : > { %v2437_v15 = vpop.eup %2436  ;;  %2151 = vmatprep.mubr.f32.mxu0 %v477_v14 }
 0x141   : > { %v2439_v18 = vpop.eup %2438  ;;  %v479_v21 = vmul.f32 %v2437_v15, %v3263_v26  ;;  %vm726_vm0 = vcmp.lt.s32.totalorder %v3314_v23, 16 }
 0x142   : > { %v480_v16 = vmul.f32 %v2439_v18, %v3266_v27 }
 0x143   : > { %2152 = vmatmul.mubr.f32.gmra.mrb[26].mxu0 %v478_v11 }
 0x144   : > { %v2441_v19 = vpop.eup %2440  ;;  %2154 = vmatprep.mubr.f32.mxu0 %v479_v21 }
 0x145   : > { %v2443_v24 = vpop.eup %2442  ;;  %v481_v17 = vmul.f32 %v2441_v19, %v3273_v32 }
 0x146   : > { %v482_v28 = vmul.f32 %v2443_v24, %v3276_v33 }
 0x147   : > { %2155 = vmatmul.mubr.f32.gmra.mrb[28].mxu0 %v480_v16 }
 0x148   : > { %2157 = vmatprep.mubr.f32.mxu0 %v481_v17 }
 0x14b   : > { %2158 = vmatmul.mubr.f32.gmra.mrb[30].mxu0 %v482_v28 }
 0x1e2   : > { %v2114_v25 = vpop.f32.mrb[0].mxu0 }
 0x1e3   : > { %v565_v26 = vpop.f32.mrb[1].mxu0  ;;  %v3319_v27 = vsel %vm726_vm0, %v2114_v25, -1e+30 }
 0x1e4   : > { %761 = vmax.xlane.f32.xlu1 %v3319_v27  ;;  %v3324_v32 = vsel %vm726_vm0, %v565_v26, -1e+30 }
 0x1e5   : > { %759 = vmax.xlane.f32.xlu0 %v3324_v32 }
 0x1e6   : > { %v2117_v33 = vpop.f32.mrb[2].mxu0 }
 0x1e7   : > { %v575_v30 = vpop.f32.mrb[3].mxu0  ;;  %v3329_v0 = vsel %vm726_vm0, %v2117_v33, -1e+30 }
 0x1e8   : > { %765 = vmax.xlane.f32.xlu1 %v3329_v0  ;;  %v3334_v31 = vsel %vm726_vm0, %v575_v30, -1e+30 }
 0x1e9   : > { %763 = vmax.xlane.f32.xlu0 %v3334_v31 }
 0x1ea   : > { %v2120_v29 = vpop.f32.mrb[4].mxu0 }
 0x1eb   : > { %v585_v34 = vpop.f32.mrb[5].mxu0  ;;  %v3339_v37 = vsel %vm726_vm0, %v2120_v29, -1e+30 }
 0x1ec   : > { %769 = vmax.xlane.f32.xlu1 %v3339_v37  ;;  %v3344_v35 = vsel %vm726_vm0, %v585_v34, -1e+30 }
 0x1ed   : > { %767 = vmax.xlane.f32.xlu0 %v3344_v35 }
 0x1ee   : > { %v2123_v38 = vpop.f32.mrb[6].mxu0 }
 0x1ef   : > { %v595_v39 = vpop.f32.mrb[7].mxu0  ;;  %v3349_v1 = vsel %vm726_vm0, %v2123_v38, -1e+30 }
 0x1f0   : > { %773 = vmax.xlane.f32.xlu1 %v3349_v1  ;;  %v3354_v40 = vsel %vm726_vm0, %v595_v39, -1e+30 }
 0x1f1   : > { %771 = vmax.xlane.f32.xlu0 %v3354_v40 }
 0x1f2   : > { %v2126_v36 = vpop.f32.mrb[8].mxu0 }
 0x1f3   : > { %v605_v2 = vpop.f32.mrb[9].mxu0  ;;  %v3359_v41 = vsel %vm726_vm0, %v2126_v36, -1e+30 }
 0x1f4   : > { %777 = vmax.xlane.f32.xlu1 %v3359_v41  ;;  %v3364_v42 = vsel %vm726_vm0, %v605_v2, -1e+30 }
 0x1f5   : > { %775 = vmax.xlane.f32.xlu0 %v3364_v42 }
 0x1f6   : > { %v2129_v44 = vpop.f32.mrb[10].mxu0 }
 0x1f7   : > { %v615_v45 = vpop.f32.mrb[11].mxu0  ;;  %v3369_v46 = vsel %vm726_vm0, %v2129_v44, -1e+30 }
 0x1f8   : > { %781 = vmax.xlane.f32.xlu1 %v3369_v46  ;;  %v3374_v5 = vsel %vm726_vm0, %v615_v45, -1e+30 }
 0x1f9   : > { %779 = vmax.xlane.f32.xlu0 %v3374_v5 }
 0x1fa   : > { %v2132_v43 = vpop.f32.mrb[12].mxu0 }
 0x1fb   : > { %v625_v47 = vpop.f32.mrb[13].mxu0  ;;  %v3379_v48 = vsel %vm726_vm0, %v2132_v43, -1e+30 }
 0x1fc   : > { %785 = vmax.xlane.f32.xlu1 %v3379_v48  ;;  %v3384_v49 = vsel %vm726_vm0, %v625_v47, -1e+30 }
 0x1fd   : > { %783 = vmax.xlane.f32.xlu0 %v3384_v49 }
 0x1fe   : > { %v2135_v8 = vpop.f32.mrb[14].mxu0 }
 0x1ff   : > { %v635_v51 = vpop.f32.mrb[15].mxu0  ;;  %v3389_v52 = vsel %vm726_vm0, %v2135_v8, -1e+30 }
 0x200   : > { %789 = vmax.xlane.f32.xlu1 %v3389_v52  ;;  %v3394_v53 = vsel %vm726_vm0, %v635_v51, -1e+30 }
 0x201   : > { %787 = vmax.xlane.f32.xlu0 %v3394_v53 }
 0x202   : > { %v2138_v50 = vpop.f32.mrb[16].mxu0 }
 0x203   : > { %v645_v54 = vpop.f32.mrb[17].mxu0  ;;  %v3399_v9 = vsel %vm726_vm0, %v2138_v50, -1e+30 }
 0x204   : > { %793 = vmax.xlane.f32.xlu1 %v3399_v9  ;;  %v3404_v56 = vsel %vm726_vm0, %v645_v54, -1e+30 }
 0x205   : > { %791 = vmax.xlane.f32.xlu0 %v3404_v56 }
 0x206   : > { %v2141_v55 = vpop.f32.mrb[18].mxu0 }
 0x207   : > { %v655_v58 = vpop.f32.mrb[19].mxu0  ;;  %v3409_v12 = vsel %vm726_vm0, %v2141_v55, -1e+30 }
 0x208   : > { %797 = vmax.xlane.f32.xlu1 %v3409_v12  ;;  %v3414_v59 = vsel %vm726_vm0, %v655_v58, -1e+30 }
 0x209   : > { %795 = vmax.xlane.f32.xlu0 %v3414_v59 }
 0x20a   : > { %v2144_v57 = vpop.f32.mrb[20].mxu0 }
 0x20b   : > { %v665_v60 = vpop.f32.mrb[21].mxu0  ;;  %v3419_v61 = vsel %vm726_vm0, %v2144_v57, -1e+30 }
 0x20c   : > { %801 = vmax.xlane.f32.xlu1 %v3419_v61  ;;  %v3424_v63 = vsel %vm726_vm0, %v665_v60, -1e+30 }
 0x20d   : > { %799 = vmax.xlane.f32.xlu0 %v3424_v63 }
 0x20e   : > { %v2147_v62 = vpop.f32.mrb[22].mxu0 }
 0x20f   : > { %v675_v13 = vpop.f32.mrb[23].mxu0  ;;  %v3429_v4 = vsel %vm726_vm0, %v2147_v62, -1e+30 }
 0x210   : > { %805 = vmax.xlane.f32.xlu1 %v3429_v4  ;;  %v3434_v6 = vsel %vm726_vm0, %v675_v13, -1e+30 }
 0x211   : > { %803 = vmax.xlane.f32.xlu0 %v3434_v6 }
 0x212   : > { %v2150_v3 = vpop.f32.mrb[24].mxu0 }
 0x213   : > { %v685_v20 = vpop.f32.mrb[25].mxu0  ;;  %v3439_v10 = vsel %vm726_vm0, %v2150_v3, -1e+30 }
 0x214   : > { %809 = vmax.xlane.f32.xlu1 %v3439_v10  ;;  %v3444_v7 = vsel %vm726_vm0, %v685_v20, -1e+30 }
 0x215   : > { %807 = vmax.xlane.f32.xlu0 %v3444_v7 }
 0x216   : > { %v2153_v14 = vpop.f32.mrb[26].mxu0 }
 0x217   : > { %v695_v11 = vpop.f32.mrb[27].mxu0  ;;  %v3449_v15 = vsel %vm726_vm0, %v2153_v14, -1e+30 }
 0x218   : > { %813 = vmax.xlane.f32.xlu1 %v3449_v15  ;;  %v3454_v18 = vsel %vm726_vm0, %v695_v11, -1e+30 }
 0x219   : > { %811 = vmax.xlane.f32.xlu0 %v3454_v18 }
 0x21a   : > { %v2156_v21 = vpop.f32.mrb[28].mxu0 }
 0x21b   : > { %v705_v16 = vpop.f32.mrb[29].mxu0  ;;  %v3459_v19 = vsel %vm726_vm0, %v2156_v21, -1e+30 }
 0x21c   : > { %817 = vmax.xlane.f32.xlu1 %v3459_v19  ;;  %v3464_v24 = vsel %vm726_vm0, %v705_v16, -1e+30 }
 0x21d   : > { %815 = vmax.xlane.f32.xlu0 %v3464_v24 }
 0x21e   : > { %v2159_v17 = vpop.f32.mrb[30].mxu0 }
 0x21f   : > { %v715_v28 = vpop.f32.mrb[31].mxu0  ;;  %v3469_v22 = vsel %vm726_vm0, %v2159_v17, -1e+30 }
 0x220   : > { %821 = vmax.xlane.f32.xlu1 %v3469_v22  ;;  %v3474_v25 = vsel %vm726_vm0, %v715_v28, -1e+30 }
 0x221   : > { %819 = vmax.xlane.f32.xlu0 %v3474_v25 }
 0x271   : > { %v762_v26 = vpop.xlane.xlu1 %761 }
 0x272   : > { %v824_v33 = vsub.f32 %v3319_v27, %v762_v26  ;;  %v760_v30 = vpop.xlane.xlu0 %759 }
 0x273   : > { %v823_v29 = vsub.f32 %v3324_v32, %v760_v30 }
 0x274   : > { %v857_v34 = vmul.f32 1.442695, %v824_v33 }
 0x275   : > { %v855_v38 = vmul.f32 1.442695, %v823_v29  ;;  %v766_v39 = vpop.xlane.xlu1 %765 }
 0x276   : > { %2444 = vpow2.f32 %v857_v34  ;;  %v826_v36 = vsub.f32 %v3329_v0, %v766_v39  ;;  %v764_v2 = vpop.xlane.xlu0 %763 }
 0x277   : > { %2446 = vpow2.f32 %v855_v38  ;;  %v825_v23 = vsub.f32 %v3334_v31, %v764_v2 }
 0x278   : > { %v861_v44 = vmul.f32 1.442695, %v826_v36 }
 0x279   : > { %v859_v45 = vmul.f32 1.442695, %v825_v23  ;;  %v770_v43 = vpop.xlane.xlu1 %769 }
 0x27a   : > { %2448 = vpow2.f32 %v861_v44  ;;  %v828_v47 = vsub.f32 %v3339_v37, %v770_v43  ;;  %v768_v27 = vpop.xlane.xlu0 %767 }
 0x27b   : > { %2450 = vpow2.f32 %v859_v45  ;;  %v827_v32 = vsub.f32 %v3344_v35, %v768_v27 }
 0x27c   : > { %v865_v8 = vmul.f32 1.442695, %v828_v47 }
 0x27d   : > { %v863_v51 = vmul.f32 1.442695, %v827_v32  ;;  %v774_v50 = vpop.xlane.xlu1 %773 }
 0x27e   : > { %2452 = vpow2.f32 %v865_v8  ;;  %v830_v0 = vsub.f32 %v3349_v1, %v774_v50  ;;  %v772_v54 = vpop.xlane.xlu0 %771 }
 0x27f   : > { %2454 = vpow2.f32 %v863_v51  ;;  %v829_v31 = vsub.f32 %v3354_v40, %v772_v54 }
 0x280   : > { %v3485_v55 = vpop.eup %2444  ;;  %v869_v58 = vmul.f32 1.442695, %v830_v0 }
 0x281   : > { %v3487_v57 = vpop.eup %2446  ;;  %v867_v37 = vmul.f32 1.442695, %v829_v31  ;;  %v778_v60 = vpop.xlane.xlu1 %777  ;;  %921 = vadd.xlane.f32.xlu1 %v3485_v55 }
 0x282   : > { %2456 = vpow2.f32 %v869_v58  ;;  %v832_v35 = vsub.f32 %v3359_v41, %v778_v60  ;;  %919 = vadd.xlane.f32.xlu0 %v3487_v57  ;;  %v776_v62 = vpop.xlane.xlu0 %775 }
 0x283   : > { %2458 = vpow2.f32 %v867_v37  ;;  %v831_v1 = vsub.f32 %v3364_v42, %v776_v62 }
 0x284   : > { %v3493_v13 = vpop.eup %2448  ;;  %v873_v40 = vmul.f32 1.442695, %v832_v35 }
 0x285   : > { %v3495_v3 = vpop.eup %2450  ;;  %v871_v20 = vmul.f32 1.442695, %v831_v1  ;;  %v782_v14 = vpop.xlane.xlu1 %781  ;;  %925 = vadd.xlane.f32.xlu1 %v3493_v13 }
 0x286   : > { %2460 = vpow2.f32 %v873_v40  ;;  %v834_v11 = vsub.f32 %v3369_v46, %v782_v14  ;;  %923 = vadd.xlane.f32.xlu0 %v3495_v3  ;;  %v780_v41 = vpop.xlane.xlu0 %779 }
 0x287   : > { %2462 = vpow2.f32 %v871_v20  ;;  %v833_v21 = vsub.f32 %v3374_v5, %v780_v41 }
 0x288   : > { %v3501_v16 = vpop.eup %2452  ;;  %v877_v42 = vmul.f32 1.442695, %v834_v11 }
 0x289   : > { %v3503_v17 = vpop.eup %2454  ;;  %v875_v28 = vmul.f32 1.442695, %v833_v21  ;;  %v786_v26 = vpop.xlane.xlu1 %785  ;;  %929 = vadd.xlane.f32.xlu1 %v3501_v16 }
 0x28a   : > { %2464 = vpow2.f32 %v877_v42  ;;  %v836_v33 = vsub.f32 %v3379_v48, %v786_v26  ;;  %927 = vadd.xlane.f32.xlu0 %v3503_v17  ;;  %v784_v46 = vpop.xlane.xlu0 %783 }
 0x28b   : > { %2466 = vpow2.f32 %v875_v28  ;;  %v835_v30 = vsub.f32 %v3384_v49, %v784_v46 }
 0x28c   : > { %v3509_v29 = vpop.eup %2456  ;;  %v881_v5 = vmul.f32 1.442695, %v836_v33 }
 0x28d   : > { %v3511_v34 = vpop.eup %2458  ;;  %v879_v38 = vmul.f32 1.442695, %v835_v30  ;;  %v790_v39 = vpop.xlane.xlu1 %789  ;;  %933 = vadd.xlane.f32.xlu1 %v3509_v29 }
 0x28e   : > { %2468 = vpow2.f32 %v881_v5  ;;  %v838_v36 = vsub.f32 %v3389_v52, %v790_v39  ;;  %931 = vadd.xlane.f32.xlu0 %v3511_v34  ;;  %v788_v48 = vpop.xlane.xlu0 %787 }
 0x28f   : > { %2470 = vpow2.f32 %v879_v38  ;;  %v837_v2 = vsub.f32 %v3394_v53, %v788_v48 }
 0x290   : > { %v3517_v23 = vpop.eup %2460  ;;  %v885_v49 = vmul.f32 1.442695, %v838_v36 }
 0x291   : > { %v3519_v44 = vpop.eup %2462  ;;  %v883_v45 = vmul.f32 1.442695, %v837_v2  ;;  %v794_v43 = vpop.xlane.xlu1 %793  ;;  %937 = vadd.xlane.f32.xlu1 %v3517_v23 }
 0x292   : > { %2472 = vpow2.f32 %v885_v49  ;;  %v840_v47 = vsub.f32 %v3399_v9, %v794_v43  ;;  %935 = vadd.xlane.f32.xlu0 %v3519_v44  ;;  %v792_v52 = vpop.xlane.xlu0 %791 }
 0x293   : > { %2474 = vpow2.f32 %v883_v45  ;;  %v839_v27 = vsub.f32 %v3404_v56, %v792_v52 }
 0x294   : > { %v3525_v32 = vpop.eup %2464  ;;  %v889_v53 = vmul.f32 1.442695, %v840_v47 }
 0x295   : > { %v3527_v8 = vpop.eup %2466  ;;  %v887_v51 = vmul.f32 1.442695, %v839_v27  ;;  %v798_v50 = vpop.xlane.xlu1 %797  ;;  %941 = vadd.xlane.f32.xlu1 %v3525_v32 }
 0x296   : > { %2476 = vpow2.f32 %v889_v53  ;;  %v842_v0 = vsub.f32 %v3409_v12, %v798_v50  ;;  %939 = vadd.xlane.f32.xlu0 %v3527_v8  ;;  %v796_v9 = vpop.xlane.xlu0 %795 }
 0x297   : > { %2478 = vpow2.f32 %v887_v51  ;;  %v841_v54 = vsub.f32 %v3414_v59, %v796_v9 }
 0x298   : > { %v3533_v31 = vpop.eup %2468  ;;  %v893_v56 = vmul.f32 1.442695, %v842_v0 }
 0x299   : > { %v3535_v58 = vpop.eup %2470  ;;  %v891_v37 = vmul.f32 1.442695, %v841_v54  ;;  %v802_v60 = vpop.xlane.xlu1 %801  ;;  %945 = vadd.xlane.f32.xlu1 %v3533_v31 }
 0x29a   : > { %2480 = vpow2.f32 %v893_v56  ;;  %v844_v35 = vsub.f32 %v3419_v61, %v802_v60  ;;  %943 = vadd.xlane.f32.xlu0 %v3535_v58  ;;  %v800_v12 = vpop.xlane.xlu0 %799 }
 0x29b   : > { %2482 = vpow2.f32 %v891_v37  ;;  %v843_v62 = vsub.f32 %v3424_v63, %v800_v12 }
 0x29c   : > { %v3541_v1 = vpop.eup %2472  ;;  %v897_v59 = vmul.f32 1.442695, %v844_v35 }
 0x29d   : > { %v3543_v40 = vpop.eup %2474  ;;  %v895_v20 = vmul.f32 1.442695, %v843_v62  ;;  %v806_v14 = vpop.xlane.xlu1 %805  ;;  %949 = vadd.xlane.f32.xlu1 %v3541_v1 }
 0x29e   : > { %2484 = vpow2.f32 %v897_v59  ;;  %v846_v11 = vsub.f32 %v3429_v4, %v806_v14  ;;  %947 = vadd.xlane.f32.xlu0 %v3543_v40  ;;  %v804_v61 = vpop.xlane.xlu0 %803  ;;  %v1463_v59 = vld [vmem:[#allocation7] sm:$0xff]  ;;  %v1465_v14 = vld [vmem:[#allocation7 + $0x10] sm:$0xff] }
 0x29f   : > { %2486 = vpow2.f32 %v895_v20  ;;  %v845_v41 = vsub.f32 %v3434_v6, %v804_v61  ;;  %v1464_v20 = vld [vmem:[#allocation7 + $0x8] sm:$0xff]  ;;  %v1466_v61 = vld [vmem:[#allocation7 + $0x18] sm:$0xff] }
 0x2a0   : > { %v3549_v21 = vpop.eup %2476  ;;  %v901_v63 = vmul.f32 1.442695, %v846_v11  ;;  %v2272_v11 = vpack.c.bf16 %v1464_v20, %v1463_v59 }
 0x2a1   : > { %v3551_v42 = vpop.eup %2478  ;;  %v899_v28 = vmul.f32 1.442695, %v845_v41  ;;  %v810_v26 = vpop.xlane.xlu1 %809  ;;  %953 = vadd.xlane.f32.xlu1 %v3549_v21  ;;  %v2276_v41 = vpack.c.bf16 %v1466_v61, %v1465_v14 }
 0x2a2   : > { %2488 = vpow2.f32 %v901_v63  ;;  %v848_v33 = vsub.f32 %v3439_v10, %v810_v26  ;;  %951 = vadd.xlane.f32.xlu0 %v3551_v42  ;;  %v808_v4 = vpop.xlane.xlu0 %807  ;;  %v1467_v63 = vld [vmem:[#allocation7 + $0x20] sm:$0xff]  ;;  %2273 = vmatprep.subr.bf16.mxu1 %v2272_v11 }
 0x2a3   : > { %2490 = vpow2.f32 %v899_v28  ;;  %v847_v46 = vsub.f32 %v3444_v7, %v808_v4  ;;  %v1468_v28 = vld [vmem:[#allocation7 + $0x28] sm:$0xff]  ;;  %2275 = vmatpush3.bf16.msra.mxu1 %v2272_v11  ;;  %v1470_v4 = vld [vmem:[#allocation7 + $0x38] sm:$0xff] }
 0x2a4   : > { %v3557_v30 = vpop.eup %2480  ;;  %v905_v6 = vmul.f32 1.442695, %v848_v33  ;;  %2277 = vmatprep.subr.bf16.mxu1 %v2276_v41  ;;  %v2280_v26 = vpack.c.bf16 %v1468_v28, %v1467_v63  ;;  %v1469_v33 = vld [vmem:[#allocation7 + $0x30] sm:$0xff] }
 0x2a5   : > { %v3559_v5 = vpop.eup %2482  ;;  %v903_v38 = vmul.f32 1.442695, %v847_v46  ;;  %v814_v39 = vpop.xlane.xlu1 %813  ;;  %957 = vadd.xlane.f32.xlu1 %v3557_v30  ;;  %v2284_v46 = vpack.c.bf16 %v1470_v4, %v1469_v33 }
 0x2a6   : > { %2492 = vpow2.f32 %v905_v6  ;;  %v850_v36 = vsub.f32 %v3449_v15, %v814_v39  ;;  %955 = vadd.xlane.f32.xlu0 %v3559_v5  ;;  %v812_v10 = vpop.xlane.xlu0 %811 }
 0x2a7   : > { %2494 = vpow2.f32 %v903_v38  ;;  %v849_v48 = vsub.f32 %v3454_v18, %v812_v10  ;;  %2279 = vmatpush3.bf16.msra.mxu1 %v2276_v41 }
 0x2a8   : > { %v3565_v2 = vpop.eup %2484  ;;  %v909_v7 = vmul.f32 1.442695, %v850_v36  ;;  %2281 = vmatprep.subr.bf16.mxu1 %v2280_v26 }
 0x2a9   : > { %v3567_v49 = vpop.eup %2486  ;;  %v907_v45 = vmul.f32 1.442695, %v849_v48  ;;  %v818_v43 = vpop.xlane.xlu1 %817  ;;  %961 = vadd.xlane.f32.xlu1 %v3565_v2 }
 0x2aa   : > { %2496 = vpow2.f32 %v909_v7  ;;  %v852_v47 = vsub.f32 %v3459_v19, %v818_v43  ;;  %959 = vadd.xlane.f32.xlu0 %v3567_v49  ;;  %v816_v15 = vpop.xlane.xlu0 %815 }
 0x2ab   : > { %2498 = vpow2.f32 %v907_v45  ;;  %v851_v52 = vsub.f32 %v3464_v24, %v816_v15  ;;  %2283 = vmatpush3.bf16.msra.mxu1 %v2280_v26 }
 0x2ac   : > { %v3573_v27 = vpop.eup %2488  ;;  %v913_v18 = vmul.f32 1.442695, %v852_v47  ;;  %2285 = vmatprep.subr.bf16.mxu1 %v2284_v46 }
 0x2ad   : > { %v3575_v53 = vpop.eup %2490  ;;  %v911_v51 = vmul.f32 1.442695, %v851_v52  ;;  %965 = vadd.xlane.f32.xlu1 %v3573_v27  ;;  %v822_v50 = vpop.xlane.xlu1 %821 }
 0x2ae   : > { %2500 = vpow2.f32 %v913_v18  ;;  %v854_v0 = vsub.f32 %v3469_v22, %v822_v50  ;;  %963 = vadd.xlane.f32.xlu0 %v3575_v53  ;;  %v820_v19 = vpop.xlane.xlu0 %819 }
 0x2af   : > { %2502 = vpow2.f32 %v911_v51  ;;  %v853_v9 = vsub.f32 %v3474_v25, %v820_v19  ;;  %2287 = vmatpush3.bf16.msra.mxu1 %v2284_v46 }
 0x2b0   : > { %v3581_v54 = vpop.eup %2492  ;;  %v917_v24 = vmul.f32 1.442695, %v854_v0 }
 0x2b1   : > { %v3583_v56 = vpop.eup %2494  ;;  %v915_v37 = vmul.f32 1.442695, %v853_v9  ;;  %969 = vadd.xlane.f32.xlu1 %v3581_v54 }
 0x2b2   : > { %2504 = vpow2.f32 %v917_v24  ;;  %967 = vadd.xlane.f32.xlu0 %v3583_v56 }
 0x2b3   : > { %2506 = vpow2.f32 %v915_v37 }
 0x2b4   : > { %v3587_v60 = vpop.eup %2496 }
 0x2b5   : > { %v3589_v22 = vpop.eup %2498  ;;  %973 = vadd.xlane.f32.xlu1 %v3587_v60 }
 0x2b6   : > { %971 = vadd.xlane.f32.xlu0 %v3589_v22 }
 0x2b8   : > { %v3593_v25 = vpop.eup %2500 }
 0x2b9   : > { %v3595_v35 = vpop.eup %2502  ;;  %977 = vadd.xlane.f32.xlu1 %v3593_v25 }
 0x2ba   : > { %975 = vadd.xlane.f32.xlu0 %v3595_v35 }
 0x2bc   : > { %v3599_v12 = vpop.eup %2504 }
 0x2bd   : > { %v3601_v62 = vpop.eup %2506  ;;  %981 = vadd.xlane.f32.xlu1 %v3599_v12 }
 0x2be   : > { %979 = vadd.xlane.f32.xlu0 %v3601_v62 }
 0x30e   : > { %v922_v6 = vpop.xlane.xlu1 %921 }
 0x30f   : > { %2508 = vrcp.f32 %v922_v6  ;;  %v920_v38 = vpop.xlane.xlu0 %919 }
 0x310   : > { %2510 = vrcp.f32 %v920_v38 }
 0x312   : > { %v926_v39 = vpop.xlane.xlu1 %925 }
 0x313   : > { %2512 = vrcp.f32 %v926_v39  ;;  %v924_v36 = vpop.xlane.xlu0 %923 }
 0x314   : > { %2514 = vrcp.f32 %v924_v36 }
 0x316   : > { %v930_v10 = vpop.xlane.xlu1 %929 }
 0x317   : > { %2516 = vrcp.f32 %v930_v10  ;;  %v928_v48 = vpop.xlane.xlu0 %927 }
 0x318   : > { %2518 = vrcp.f32 %v928_v48 }
 0x319   : > { %v2509_v7 = vpop.eup %2508 }
 0x31a   : > { %v2511_v45 = vpop.eup %2510  ;;  %v934_v43 = vpop.xlane.xlu1 %933  ;;  %v1016_v47 = vmul.f32 %v2509_v7, %v3485_v55 }
 0x31b   : > { %2520 = vrcp.f32 %v934_v43  ;;  %v932_v15 = vpop.xlane.xlu0 %931  ;;  %v1015_v52 = vmul.f32 %v2511_v45, %v3487_v57 }
 0x31c   : > { %2522 = vrcp.f32 %v932_v15  ;;  %v1942_v18 = vadd.f32 -0.0025, %v1016_v47 }
 0x31d   : > { %v2513_v51 = vpop.eup %2512  ;;  %v1941_v50 = vadd.f32 -0.0025, %v1015_v52 }
 0x31e   : > { %v2515_v0 = vpop.eup %2514  ;;  %v938_v19 = vpop.xlane.xlu1 %937  ;;  %v1144_v9 = vand.u32 2147483647, %v1942_v18  ;;  %v1018_v24 = vmul.f32 %v2513_v51, %v3493_v13  ;;  %v1080_v33 = vmax.f32 %v1942_v18, 0.0 }
 0x31f   : > { %2524 = vrcp.f32 %v938_v19  ;;  %v936_v37 = vpop.xlane.xlu0 %935  ;;  %v1143_v59 = vand.u32 2147483647, %v1941_v50  ;;  %v1017_v20 = vmul.f32 %v2515_v0, %v3495_v3  ;;  %v1079_v48 = vmax.f32 %v1941_v50, 0.0 }
 0x320   : > { %2526 = vrcp.f32 %v936_v37  ;;  %v1176_v55 = vadd.f32 1e-12, %v1144_v9  ;;  %v1944_v14 = vadd.f32 -0.0025, %v1018_v24  ;;  %v1112_v43 = vmul.f32 %v1080_v33, %v1016_v47 }
 0x321   : > { %v2517_v11 = vpop.eup %2516  ;;  %v1175_v61 = vadd.f32 1e-12, %v1143_v59  ;;  %v1943_v57 = vadd.f32 -0.0025, %v1017_v20 }
 0x322   : > { %v2519_v41 = vpop.eup %2518  ;;  %v942_v63 = vpop.xlane.xlu1 %941  ;;  %2528 = vrcp.f32 %v1176_v55  ;;  %v1146_v28 = vand.u32 2147483647, %v1944_v14  ;;  %v3610_v26 = vmul.f32 %v2517_v11, %v3501_v16  ;;  %v1082_v51 = vmax.f32 %v1944_v14, 0.0 }
 0x323   : > { %2530 = vrcp.f32 %v942_v63  ;;  %v940_v13 = vpop.xlane.xlu0 %939  ;;  %v1145_v4 = vand.u32 2147483647, %v1943_v57  ;;  %v3613_v46 = vmul.f32 %v2519_v41, %v3503_v17  ;;  %v1081_v9 = vmax.f32 %v1943_v57, 0.0 }
 0x324   : > { %2532 = vrcp.f32 %v940_v13  ;;  %v1178_v3 = vadd.f32 1e-12, %v1146_v28  ;;  %v1946_v6 = vadd.f32 -0.0025, %v3610_v26  ;;  %v1111_v55 = vmul.f32 %v1079_v48, %v1015_v52 }
 0x325   : > { %v2521_v38 = vpop.eup %2520  ;;  %2534 = vrcp.f32 %v1175_v61  ;;  %v1177_v39 = vadd.f32 1e-12, %v1145_v4  ;;  %v3617_v36 = vadd.f32 -0.0025, %v3613_v46  ;;  %v1114_v28 = vmul.f32 %v1082_v51, %v1018_v24 }
 0x326   : > { %v2523_v10 = vpop.eup %2522  ;;  %v946_v16 = vpop.xlane.xlu1 %945  ;;  %2536 = vrcp.f32 %v1178_v3  ;;  %v1148_v7 = vand.u32 2147483647, %v1946_v6  ;;  %v3620_v45 = vmul.f32 %v2521_v38, %v3509_v29  ;;  %v1084_v61 = vmax.f32 %v1946_v6, 0.0 }
 0x327   : > { %2538 = vrcp.f32 %v946_v16  ;;  %v944_v17 = vpop.xlane.xlu0 %943  ;;  %v1147_v15 = vand.u32 2147483647, %v3617_v36  ;;  %v3624_v18 = vmul.f32 %v2523_v10, %v3511_v34 }
 0x328   : > { %2540 = vrcp.f32 %v944_v17  ;;  %v1180_v0 = vadd.f32 1e-12, %v1148_v7  ;;  %v3627_v19 = vadd.f32 -0.0025, %v3620_v45  ;;  %v1116_v7 = vmul.f32 %v1084_v61, %v3610_v26 }
 0x329   : > { %v2525_v50 = vpop.eup %2524  ;;  %2542 = vrcp.f32 %v1177_v39  ;;  %v1179_v37 = vadd.f32 1e-12, %v1147_v15  ;;  %v3630_v29 = vadd.f32 -0.0025, %v3624_v18  ;;  %v1083_v39 = vmax.f32 %v3617_v36, 0.0 }
 0x32a   : > { %v2527_v59 = vpop.eup %2526  ;;  %v950_v47 = vpop.xlane.xlu1 %949  ;;  %2544 = vrcp.f32 %v1180_v0  ;;  %v1150_v34 = vand.u32 2147483647, %v3627_v19  ;;  %v3634_v11 = vmul.f32 %v2525_v50, %v3517_v23  ;;  %v1113_v23 = vmul.f32 %v1081_v9, %v1017_v20 }
 0x32b   : > { %2546 = vrcp.f32 %v950_v47  ;;  %v948_v14 = vpop.xlane.xlu0 %947  ;;  %v1149_v41 = vand.u32 2147483647, %v3630_v29  ;;  %v3638_v57 = vmul.f32 %v2527_v59, %v3519_v44  ;;  %v1086_v15 = vmax.f32 %v3627_v19, 0.0 }
 0x32c   : > { %v2529_v63 = vpop.eup %2528  ;;  %2548 = vrcp.f32 %v948_v14  ;;  %v1182_v13 = vadd.f32 1e-12, %v1150_v34  ;;  %v3641_v52 = vadd.f32 -0.0025, %v3634_v11  ;;  %v1085_v9 = vmax.f32 %v3630_v29, 0.0 }
 0x32d   : > { %v2531_v33 = vpop.eup %2530  ;;  %v3643_v4 = vmul.f32 %v2529_v63, %v1112_v43  ;;  %2550 = vrcp.f32 %v1179_v37  ;;  %v1181_v3 = vadd.f32 1e-12, %v1149_v41  ;;  %v3648_v10 = vadd.f32 -0.0025, %v3638_v57 }
 0x32e   : > { %v2533_v38 = vpop.eup %2532  ;;  %v954_v6 = vpop.xlane.xlu1 %953  ;;  %2552 = vrcp.f32 %v1182_v13  ;;  %v1152_v44 = vand.u32 2147483647, %v3641_v52  ;;  %v3653_v20 = vmul.f32 %v2531_v33, %v3525_v32  ;;  %v1088_v29 = vmax.f32 %v3641_v52, 0.0 }
 0x32f   : > { %v2535_v24 = vpop.eup %2534  ;;  %v952_v16 = vpop.xlane.xlu0 %951  ;;  %v1272_v48 = vand.u32 2147483647, %v3643_v4  ;;  %v3656_v17 = vmul.f32 %v2533_v38, %v3527_v8  ;;  %2554 = vrcp.f32 %v954_v6  ;;  %v1151_v32 = vand.u32 2147483647, %v3648_v10 }
 0x330   : > { %v2537_v43 = vpop.eup %2536  ;;  %v3658_v36 = vmul.f32 %v2535_v24, %v1111_v55  ;;  %v1184_v51 = vadd.f32 1e-12, %v1152_v44  ;;  %2556 = vrcp.f32 %v1181_v3  ;;  %v3667_v59 = vadd.f32 -0.0025, %v3653_v20 }
 0x331   : > { %v2539_v0 = vpop.eup %2538  ;;  %1305 = vadd.xlane.f32.xlu1 %v1272_v48  ;;  %v3661_v50 = vmul.f32 %v2537_v43, %v1114_v28  ;;  %v3670_v19 = vadd.f32 -0.0025, %v3656_v17  ;;  %v1183_v14 = vadd.f32 1e-12, %v1151_v32  ;;  %v1115_v63 = vmul.f32 %v1083_v39, %v3613_v46 }
 0x332   : > { %v2541_v26 = vpop.eup %2540  ;;  %v958_v37 = vpop.xlane.xlu1 %957  ;;  %v1271_v8 = vand.u32 2147483647, %v3658_v36  ;;  %2558 = vrcp.f32 %v1184_v51  ;;  %v1154_v28 = vand.u32 2147483647, %v3667_v59  ;;  %v1118_v3 = vmul.f32 %v1086_v15, %v3620_v45 }
 0x333   : > { %v2543_v47 = vpop.eup %2542  ;;  %2560 = vrcp.f32 %v952_v16  ;;  %v956_v55 = vpop.xlane.xlu0 %955  ;;  %v1274_v34 = vand.u32 2147483647, %v3661_v50  ;;  %v1153_v38 = vand.u32 2147483647, %v3670_v19  ;;  %v3685_v46 = vmul.f32 %v2539_v0, %v3533_v31 }
 0x334   : > { %v2545_v61 = vpop.eup %2544  ;;  %2562 = vrcp.f32 %v958_v37  ;;  %1303 = vadd.xlane.f32.xlu0 %v1271_v8  ;;  %v3674_v41 = vmul.f32 %v2543_v47, %v1113_v23  ;;  %v1117_v23 = vmul.f32 %v1085_v9, %v3624_v18  ;;  %v1186_v24 = vadd.f32 1e-12, %v1154_v28 }
 0x335   : > { %v2547_v13 = vpop.eup %2546  ;;  %1309 = vadd.xlane.f32.xlu1 %v1274_v34  ;;  %v3678_v33 = vmul.f32 %v2545_v61, %v1116_v7  ;;  %2564 = vrcp.f32 %v1183_v14  ;;  %v1120_v7 = vmul.f32 %v1088_v29, %v3634_v11  ;;  %v1087_v45 = vmax.f32 %v3648_v10, 0.0 }
 0x336   : > { %v2549_v52 = vpop.eup %2548  ;;  %v962_v6 = vpop.xlane.xlu1 %961  ;;  %v1273_v44 = vand.u32 2147483647, %v3674_v41  ;;  %v1185_v43 = vadd.f32 1e-12, %v1153_v38  ;;  %v1090_v32 = vmax.f32 %v3667_v59, 0.0  ;;  %v3697_v31 = vmul.f32 %v2541_v26, %v3535_v58 }
 0x337   : > { %v2551_v39 = vpop.eup %2550  ;;  %v960_v16 = vpop.xlane.xlu0 %959  ;;  %v1276_v48 = vand.u32 2147483647, %v3678_v33  ;;  %v3694_v18 = vadd.f32 -0.0025, %v3685_v46  ;;  %2566 = vrcp.f32 %v1186_v24  ;;  %v1089_v11 = vmax.f32 %v3670_v19, 0.0 }
 0x338   : > { %v2553_v15 = vpop.eup %2552  ;;  %1307 = vadd.xlane.f32.xlu0 %v1273_v44  ;;  %v3690_v51 = vmul.f32 %v2551_v39, %v1115_v63  ;;  %v3703_v10 = vmul.f32 %v2547_v13, %v3541_v1  ;;  %2568 = vrcp.f32 %v1185_v43  ;;  %v3708_v47 = vmul.f32 %v2549_v52, %v3543_v40 }
 0x339   : > { %1313 = vadd.xlane.f32.xlu1 %v1276_v48  ;;  %v3699_v0 = vmul.f32 %v2553_v15, %v1118_v3  ;;  %v2555_v9 = vpop.eup %2554  ;;  %v1156_v59 = vand.u32 2147483647, %v3694_v18  ;;  %2570 = vrcp.f32 %v956_v55  ;;  %v3712_v19 = vadd.f32 -0.0025, %v3697_v31 }
 0x33a   : > { %v966_v37 = vpop.xlane.xlu1 %965  ;;  %v1275_v8 = vand.u32 2147483647, %v3690_v51  ;;  %v2557_v58 = vpop.eup %2556  ;;  %v3715_v1 = vadd.f32 -0.0025, %v3703_v10  ;;  %2572 = vrcp.f32 %v962_v6  ;;  %v1119_v61 = vmul.f32 %v1087_v45, %v3638_v57 }
 0x33b   : > { %v964_v26 = vpop.xlane.xlu0 %963  ;;  %v1278_v34 = vand.u32 2147483647, %v3699_v0  ;;  %v3717_v14 = vmul.f32 %v2557_v58, %v1117_v23  ;;  %v1188_v40 = vadd.f32 1e-12, %v1156_v59  ;;  %2574 = vrcp.f32 %v960_v16 }
 0x33c   : > { %v2559_v29 = vpop.eup %2558  ;;  %1311 = vadd.xlane.f32.xlu0 %v1275_v8  ;;  %v1122_v28 = vmul.f32 %v1090_v32, %v3653_v20  ;;  %v1155_v13 = vand.u32 2147483647, %v3712_v19  ;;  %v1158_v6 = vand.u32 2147483647, %v3715_v1  ;;  %v1955_v44 = vadd.f32 -0.0025, %v3708_v47 }
 0x33d   : > { %v2561_v63 = vpop.eup %2560  ;;  %1317 = vadd.xlane.f32.xlu1 %v1278_v34  ;;  %v3720_v55 = vmul.f32 %v2559_v29, %v1120_v7  ;;  %v1277_v52 = vand.u32 2147483647, %v3717_v14  ;;  %2576 = vrcp.f32 %v1188_v40  ;;  %v1121_v39 = vmul.f32 %v1089_v11, %v3656_v17 }
 0x33e   : > { %v2563_v3 = vpop.eup %2562  ;;  %v970_v38 = vpop.xlane.xlu1 %969  ;;  %2578 = vrcp.f32 %v966_v37  ;;  %v1187_v16 = vadd.f32 1e-12, %v1155_v13  ;;  %v1092_v48 = vmax.f32 %v3694_v18, 0.0  ;;  %v1190_v7 = vadd.f32 1e-12, %v1158_v6 }
 0x33f   : > { %v2565_v57 = vpop.eup %2564  ;;  %v968_v23 = vpop.xlane.xlu0 %967  ;;  %v1280_v24 = vand.u32 2147483647, %v3720_v55  ;;  %2580 = vrcp.f32 %v964_v26  ;;  %v1091_v45 = vmax.f32 %v3712_v19, 0.0  ;;  %v1157_v43 = vand.u32 2147483647, %v1955_v44 }
 0x340   : > { %1315 = vadd.xlane.f32.xlu0 %v1277_v52  ;;  %v3729_v20 = vmul.f32 %v2565_v57, %v1119_v61  ;;  %2582 = vrcp.f32 %v1187_v16  ;;  %v3734_v15 = vmul.f32 %v2555_v9, %v3549_v21  ;;  %v3738_v17 = vmul.f32 %v2561_v63, %v3551_v42 }
 0x341   : > { %1321 = vadd.xlane.f32.xlu1 %v1280_v24  ;;  %2584 = vrcp.f32 %v1190_v7  ;;  %v3741_v11 = vmul.f32 %v2563_v3, %v3557_v30  ;;  %v2567_v18 = vpop.eup %2566  ;;  %v1094_v59 = vmax.f32 %v3715_v1, 0.0  ;;  %v1189_v58 = vadd.f32 1e-12, %v1157_v43 }
 0x342   : > { %v974_v32 = vpop.xlane.xlu1 %973  ;;  %v1279_v37 = vand.u32 2147483647, %v3729_v20  ;;  %2586 = vrcp.f32 %v970_v38  ;;  %v1958_v26 = vadd.f32 -0.0025, %v3734_v15  ;;  %v2569_v21 = vpop.eup %2568  ;;  %v3745_v9 = vmul.f32 %v2567_v18, %v1122_v28 }
 0x343   : > { %v972_v8 = vpop.xlane.xlu0 %971  ;;  %2588 = vrcp.f32 %v968_v23  ;;  %v1093_v34 = vmax.f32 %v1955_v44, 0.0  ;;  %v3748_v42 = vadd.f32 -0.0025, %v3738_v17  ;;  %v2571_v19 = vpop.eup %2570  ;;  %v3750_v30 = vmul.f32 %v2569_v21, %v1121_v39 }
 0x344   : > { %1319 = vadd.xlane.f32.xlu0 %v1279_v37  ;;  %2590 = vrcp.f32 %v1189_v58  ;;  %v1160_v29 = vand.u32 2147483647, %v1958_v26  ;;  %v3753_v61 = vadd.f32 -0.0025, %v3741_v11  ;;  %v2573_v1 = vpop.eup %2572  ;;  %v1282_v40 = vand.u32 2147483647, %v3745_v9 }
 0x345   : > { %v1124_v13 = vmul.f32 %v1092_v48, %v3685_v46  ;;  %v1123_v28 = vmul.f32 %v1091_v45, %v3697_v31  ;;  %v1159_v3 = vand.u32 2147483647, %v3748_v42  ;;  %v2575_v38 = vpop.eup %2574  ;;  %2592 = vrcp.f32 %v974_v32 }
 0x346   : > { %v978_v63 = vpop.xlane.xlu1 %977  ;;  %v1281_v52 = vand.u32 2147483647, %v3750_v30  ;;  %v1126_v44 = vmul.f32 %v1094_v59, %v3703_v10  ;;  %v1192_v57 = vadd.f32 1e-12, %v1160_v29  ;;  %2594 = vrcp.f32 %v972_v8  ;;  %1325 = vadd.xlane.f32.xlu1 %v1282_v40 }
 0x347   : > { %v976_v6 = vpop.xlane.xlu0 %975  ;;  %v2577_v23 = vpop.eup %2576  ;;  %v1125_v24 = vmul.f32 %v1093_v34, %v3708_v47  ;;  %v1096_v39 = vmax.f32 %v1958_v26, 0.0  ;;  %v1191_v16 = vadd.f32 1e-12, %v1159_v3  ;;  %v1162_v48 = vand.u32 2147483647, %v3753_v61 }
 0x348   : > { %v2579_v46 = vpop.eup %2578  ;;  %1323 = vadd.xlane.f32.xlu0 %v1281_v52  ;;  %v3762_v31 = vmul.f32 %v2577_v23, %v1124_v13  ;;  %2596 = vrcp.f32 %v1192_v57  ;;  %v3766_v7 = vmul.f32 %v2571_v19, %v3559_v5  ;;  %v1095_v10 = vmax.f32 %v3748_v42, 0.0 }
 0x349   : > { %v2581_v45 = vpop.eup %2580  ;;  %2598 = vrcp.f32 %v1191_v16  ;;  %v3770_v43 = vmul.f32 %v2573_v1, %v3565_v2  ;;  %v3773_v47 = vmul.f32 %v2575_v38, %v3567_v49  ;;  %v1194_v18 = vadd.f32 1e-12, %v1162_v48 }
 0x34a   : > { %v2583_v32 = vpop.eup %2582  ;;  %2600 = vrcp.f32 %v978_v63  ;;  %v1284_v37 = vand.u32 2147483647, %v3762_v31  ;;  %v3777_v8 = vadd.f32 -0.0025, %v3766_v7  ;;  %v982_v59 = vpop.xlane.xlu1 %981  ;;  %v3791_v19 = vmul.f32 %v2579_v46, %v3573_v27 }
 0x34b   : > { %v2585_v5 = vpop.eup %2584  ;;  %2602 = vrcp.f32 %v976_v6  ;;  %v3779_v58 = vmul.f32 %v2583_v32, %v1123_v28  ;;  %v3782_v26 = vadd.f32 -0.0025, %v3770_v43  ;;  %v3785_v2 = vadd.f32 -0.0025, %v3773_v47  ;;  %v980_v21 = vpop.xlane.xlu0 %979 }
 0x34c   : > { %v2587_v49 = vpop.eup %2586  ;;  %1329 = vadd.xlane.f32.xlu1 %v1284_v37  ;;  %v3787_v34 = vmul.f32 %v2585_v5, %v1126_v44  ;;  %2604 = vrcp.f32 %v1194_v18  ;;  %v1161_v42 = vand.u32 2147483647, %v3777_v8  ;;  %v1128_v40 = vmul.f32 %v1096_v39, %v3734_v15 }
 0x34d   : > { %v2589_v29 = vpop.eup %2588  ;;  %v1283_v1 = vand.u32 2147483647, %v3779_v58  ;;  %v1098_v63 = vmax.f32 %v3753_v61, 0.0  ;;  %v1164_v13 = vand.u32 2147483647, %v3782_v26  ;;  %2606 = vrcp.f32 %v982_v59 }
 0x34e   : > { %v2591_v28 = vpop.eup %2590  ;;  %v1286_v3 = vand.u32 2147483647, %v3787_v34  ;;  %v1193_v38 = vadd.f32 1e-12, %v1161_v42  ;;  %v1163_v52 = vand.u32 2147483647, %v3785_v2  ;;  %2608 = vrcp.f32 %v980_v21 }
 0x34f   : > { %1327 = vadd.xlane.f32.xlu0 %v1283_v1  ;;  %v3799_v27 = vmul.f32 %v2591_v28, %v1125_v24  ;;  %v1127_v6 = vmul.f32 %v1095_v10, %v3738_v17  ;;  %v1196_v44 = vadd.f32 1e-12, %v1164_v13  ;;  %v2593_v57 = vpop.eup %2592  ;;  %v3803_v61 = vadd.f32 -0.0025, %v3791_v19 }
 0x350   : > { %1333 = vadd.xlane.f32.xlu1 %v1286_v3  ;;  %2610 = vrcp.f32 %v1193_v38  ;;  %v1195_v15 = vadd.f32 1e-12, %v1163_v52  ;;  %v3806_v23 = vmul.f32 %v2581_v45, %v3575_v53  ;;  %v2595_v39 = vpop.eup %2594  ;;  %v3810_v24 = vmul.f32 %v2587_v49, %v3581_v54 }
 0x351   : > { %v1285_v16 = vand.u32 2147483647, %v3799_v27  ;;  %2612 = vrcp.f32 %v1196_v44  ;;  %v3813_v17 = vmul.f32 %v2589_v29, %v3583_v56  ;;  %v1097_v48 = vmax.f32 %v3777_v8, 0.0 }
 0x352   : > { %v2597_v46 = vpop.eup %2596  ;;  %2614 = vrcp.f32 %v1195_v15  ;;  %v1166_v10 = vand.u32 2147483647, %v3803_v61  ;;  %v3818_v32 = vadd.f32 -0.0025, %v3806_v23  ;;  %v1100_v37 = vmax.f32 %v3782_v26, 0.0 }
 0x353   : > { %v2599_v53 = vpop.eup %2598  ;;  %1331 = vadd.xlane.f32.xlu0 %v1285_v16  ;;  %v3820_v45 = vmul.f32 %v2597_v46, %v1128_v40  ;;  %v1099_v54 = vmax.f32 %v3785_v2, 0.0  ;;  %v3825_v56 = vadd.f32 -0.0025, %v3810_v24  ;;  %v3830_v59 = vadd.f32 -0.0025, %v3813_v17 }
 0x354   : > { %v2601_v18 = vpop.eup %2600  ;;  %v3827_v5 = vmul.f32 %v2599_v53, %v1127_v6  ;;  %v1198_v8 = vadd.f32 1e-12, %v1166_v10  ;;  %v3833_v49 = vmul.f32 %v2593_v57, %v3587_v60  ;;  %v1130_v26 = vmul.f32 %v1098_v63, %v3741_v11 }
 0x355   : > { %v2603_v21 = vpop.eup %2602  ;;  %v1288_v42 = vand.u32 2147483647, %v3820_v45  ;;  %v1165_v2 = vand.u32 2147483647, %v3818_v32  ;;  %v1129_v40 = vmul.f32 %v1097_v48, %v3766_v7  ;;  %v1168_v13 = vand.u32 2147483647, %v3825_v56 }
 0x356   : > { %v2605_v29 = vpop.eup %2604  ;;  %v1287_v1 = vand.u32 2147483647, %v3827_v5  ;;  %2616 = vrcp.f32 %v1198_v8  ;;  %v1132_v60 = vmul.f32 %v1100_v37, %v3770_v43  ;;  %v1131_v3 = vmul.f32 %v1099_v54, %v3773_v47 }
 0x357   : > { %1337 = vadd.xlane.f32.xlu1 %v1288_v42  ;;  %v3841_v28 = vmul.f32 %v2605_v29, %v1130_v26  ;;  %v1197_v38 = vadd.f32 1e-12, %v1165_v2  ;;  %v2607_v52 = vpop.eup %2606  ;;  %v1200_v11 = vadd.f32 1e-12, %v1168_v13  ;;  %v1167_v63 = vand.u32 2147483647, %v3830_v59 }
 0x358   : > { %1335 = vadd.xlane.f32.xlu0 %v1287_v1  ;;  %v3847_v6 = vadd.f32 -0.0025, %v3833_v49  ;;  %v3850_v7 = vmul.f32 %v2595_v39, %v3589_v22  ;;  %v2609_v44 = vpop.eup %2608  ;;  %v3854_v43 = vmul.f32 %v2601_v18, %v3593_v25  ;;  %v3857_v47 = vmul.f32 %v2603_v21, %v3595_v35  ;;  %v1471_v2 = vld [vmem:[#allocation7 + $0x40] sm:$0xff]  ;;  %v1472_v29 = vld [vmem:[#allocation7 + $0x48] sm:$0xff] }
 0x359   : > { %v1290_v57 = vand.u32 2147483647, %v3841_v28  ;;  %2618 = vrcp.f32 %v1197_v38  ;;  %v1102_v16 = vmax.f32 %v3803_v61, 0.0  ;;  %v1199_v46 = vadd.f32 1e-12, %v1167_v63 }
 0x35a   : > { %v2611_v15 = vpop.eup %2610  ;;  %2620 = vrcp.f32 %v1200_v11  ;;  %v1170_v48 = vand.u32 2147483647, %v3847_v6  ;;  %v1101_v39 = vmax.f32 %v3818_v32, 0.0  ;;  %v3865_v53 = vadd.f32 -0.0025, %v3850_v7 }
 0x35b   : > { %v2613_v10 = vpop.eup %2612  ;;  %1341 = vadd.xlane.f32.xlu1 %v1290_v57  ;;  %v3861_v22 = vmul.f32 %v2611_v15, %v1129_v40  ;;  %v3868_v25 = vadd.f32 -0.0025, %v3854_v43  ;;  %2622 = vrcp.f32 %v1199_v46  ;;  %v3873_v54 = vadd.f32 -0.0025, %v3857_v47  ;;  %v1473_v57 = vld [vmem:[#allocation7 + $0x50] sm:$0xff]  ;;  %v1474_v15 = vld [vmem:[#allocation7 + $0x58] sm:$0xff] }
 0x35c   : > { %v2615_v35 = vpop.eup %2614  ;;  %v3870_v37 = vmul.f32 %v2613_v10, %v1132_v60  ;;  %v1202_v61 = vadd.f32 1e-12, %v1170_v48  ;;  %v1169_v32 = vand.u32 2147483647, %v3865_v53  ;;  %v1134_v42 = vmul.f32 %v1102_v16, %v3791_v19 }
 0x35d   : > { %v1289_v18 = vand.u32 2147483647, %v3861_v22  ;;  %v3876_v8 = vmul.f32 %v2615_v35, %v1131_v3  ;;  %v1172_v26 = vand.u32 2147483647, %v3868_v25  ;;  %v1104_v40 = vmax.f32 %v3825_v56, 0.0  ;;  %v1475_v35 = vld [vmem:[#allocation7 + $0x60] sm:$0xff] }
 0x35e   : > { %v1292_v21 = vand.u32 2147483647, %v3870_v37  ;;  %2624 = vrcp.f32 %v1202_v61  ;;  %v1103_v13 = vmax.f32 %v3830_v59, 0.0  ;;  %v1201_v60 = vadd.f32 1e-12, %v1169_v32  ;;  %v1476_v61 = vld [vmem:[#allocation7 + $0x68] sm:$0xff] }
 0x35f   : > { %1339 = vadd.xlane.f32.xlu0 %v1289_v18  ;;  %v1291_v1 = vand.u32 2147483647, %v3876_v8  ;;  %v1133_v38 = vmul.f32 %v1101_v39, %v3806_v23  ;;  %v1204_v11 = vadd.f32 1e-12, %v1172_v26  ;;  %v1171_v19 = vand.u32 2147483647, %v3873_v54 }
 0x360   : > { %v2617_v3 = vpop.eup %2616  ;;  %1345 = vadd.xlane.f32.xlu1 %v1292_v21  ;;  %v3888_v63 = vmul.f32 %v2607_v52, %v3599_v12  ;;  %v1106_v46 = vmax.f32 %v3847_v6, 0.0  ;;  %2626 = vrcp.f32 %v1201_v60  ;;  %v3894_v56 = vmul.f32 %v2609_v44, %v3601_v62  ;;  %v1477_v60 = vld [vmem:[#allocation7 + $0x70] sm:$0xff] }
 0x361   : > { %v3890_v16 = vmul.f32 %v2617_v3, %v1134_v42  ;;  %2628 = vrcp.f32 %v1204_v11  ;;  %v1203_v59 = vadd.f32 1e-12, %v1171_v19  ;;  %v2288_v48 = vpack.c.bf16 %v1472_v29, %v1471_v2 }
 0x362   : > { %v3897_v23 = vadd.f32 -0.0025, %v3888_v63  ;;  %v1136_v52 = vmul.f32 %v1104_v40, %v3810_v24  ;;  %v3902_v39 = vadd.f32 -0.0025, %v3894_v56  ;;  %v2292_v6 = vpack.c.bf16 %v1474_v15, %v1473_v57 }
 0x363   : > { %v2619_v10 = vpop.eup %2618  ;;  %1343 = vadd.xlane.f32.xlu0 %v1291_v1  ;;  %v1294_v12 = vand.u32 2147483647, %v3890_v16  ;;  %2630 = vrcp.f32 %v1203_v59  ;;  %2289 = vmatprep.subr.bf16.mxu1 %v2288_v48  ;;  %v1135_v21 = vmul.f32 %v1103_v13, %v3813_v17  ;;  %v1138_v24 = vmul.f32 %v1106_v46, %v3833_v49  ;;  %v1478_v49 = vld [vmem:[#allocation7 + $0x78] sm:$0xff] }
 0x364   : > { %v2621_v62 = vpop.eup %2620  ;;  %v3904_v44 = vmul.f32 %v2619_v10, %v1133_v38  ;;  %v1174_v18 = vand.u32 2147483647, %v3897_v23  ;;  %v1173_v42 = vand.u32 2147483647, %v3902_v39  ;;  %2291 = vmatpush3.bf16.msra.mxu1 %v2288_v48  ;;  %v1105_v29 = vmax.f32 %v3865_v53, 0.0 }
 0x365   : > { %1349 = vadd.xlane.f32.xlu1 %v1294_v12  ;;  %v3907_v32 = vmul.f32 %v2621_v62, %v1136_v52  ;;  %v2623_v26 = vpop.eup %2622  ;;  %2293 = vmatprep.subr.bf16.mxu1 %v2292_v6  ;;  %v2296_v40 = vpack.c.bf16 %v1476_v61, %v1475_v35  ;;  %v1108_v17 = vmax.f32 %v3868_v25, 0.0  ;;  %v1107_v53 = vmax.f32 %v3873_v54, 0.0 }
 0x366   : > { %v1293_v2 = vand.u32 2147483647, %v3904_v44  ;;  %v1206_v1 = vadd.f32 1e-12, %v1174_v18  ;;  %v3915_v38 = vmul.f32 %v2623_v26, %v1135_v21  ;;  %v1205_v13 = vadd.f32 1e-12, %v1173_v42 }
 0x367   : > { %v1296_v3 = vand.u32 2147483647, %v3907_v32  ;;  %v1137_v15 = vmul.f32 %v1105_v29, %v3850_v7  ;;  %v2300_v46 = vpack.c.bf16 %v1478_v49, %v1477_v60  ;;  %v1140_v48 = vmul.f32 %v1108_v17, %v3854_v43 }
 0x368   : > { %v2625_v11 = vpop.eup %2624  ;;  %1347 = vadd.xlane.f32.xlu0 %v1293_v2  ;;  %2632 = vrcp.f32 %v1206_v1  ;;  %v1295_v19 = vand.u32 2147483647, %v3915_v38  ;;  %2295 = vmatpush3.bf16.msra.mxu1 %v2292_v6  ;;  %v1139_v54 = vmul.f32 %v1107_v53, %v3857_v47  ;;  %v1110_v6 = vmax.f32 %v3897_v23, 0.0 }
 0x369   : > { %1353 = vadd.xlane.f32.xlu1 %v1296_v3  ;;  %v3919_v57 = vmul.f32 %v2625_v11, %v1138_v24  ;;  %2634 = vrcp.f32 %v1205_v13  ;;  %2297 = vmatprep.subr.bf16.mxu1 %v2296_v40  ;;  %v1109_v61 = vmax.f32 %v3902_v39, 0.0 }
 0x36a   : > { %v2627_v59 = vpop.eup %2626  ;;  %v1142_v21 = vmul.f32 %v1110_v6, %v3888_v63 }
 0x36b   : > { %v1298_v25 = vand.u32 2147483647, %v3919_v57  ;;  %v2629_v10 = vpop.eup %2628  ;;  %v3925_v12 = vmul.f32 %v2627_v59, %v1137_v15  ;;  %v1141_v23 = vmul.f32 %v1109_v61, %v3894_v56 }
 0x36c   : > { %1351 = vadd.xlane.f32.xlu0 %v1295_v19  ;;  %v3927_v52 = vmul.f32 %v2629_v10, %v1140_v48  ;;  %2299 = vmatpush3.bf16.msra.mxu1 %v2296_v40 }
 0x36d   : > { %1357 = vadd.xlane.f32.xlu1 %v1298_v25  ;;  %v2631_v7 = vpop.eup %2630  ;;  %v1297_v35 = vand.u32 2147483647, %v3925_v12  ;;  %2301 = vmatprep.subr.bf16.mxu1 %v2300_v46 }
 0x36e   : > { %v1300_v43 = vand.u32 2147483647, %v3927_v52  ;;  %v3934_v62 = vmul.f32 %v2631_v7, %v1139_v54 }
 0x370   : > { %1355 = vadd.xlane.f32.xlu0 %v1297_v35  ;;  %v1299_v18 = vand.u32 2147483647, %v3934_v62  ;;  %2303 = vmatpush3.bf16.msra.mxu1 %v2300_v46 }
 0x371   : > { %1361 = vadd.xlane.f32.xlu1 %v1300_v43 }
 0x372   : > { %v2633_v47 = vpop.eup %2632 }
 0x373   : > { %v2635_v24 = vpop.eup %2634  ;;  %v3939_v42 = vmul.f32 %v2633_v47, %v1142_v21 }
 0x374   : > { %1359 = vadd.xlane.f32.xlu0 %v1299_v18  ;;  %v3941_v39 = vmul.f32 %v2635_v24, %v1141_v23 }
 0x375   : > { %v1302_v26 = vand.u32 2147483647, %v3939_v42 }
 0x376   : > { %v1301_v2 = vand.u32 2147483647, %v3941_v39 }
 0x377   : > { %1365 = vadd.xlane.f32.xlu1 %v1302_v26 }
 0x378   : > { %1363 = vadd.xlane.f32.xlu0 %v1301_v2 }
 0x3be   : > { %v1306_v29 = vpop.xlane.xlu1 %1305 }
 0x3bf   : > { %v1368_v1 = vmax.f32 %v1306_v29, 1e-12 }
 0x3c1   : > { %2636 = vrcp.f32 %v1368_v1  ;;  %v1304_v63 = vpop.xlane.xlu0 %1303 }
 0x3c2   : > { %v1367_v40 = vmax.f32 %v1304_v63, 1e-12  ;;  %v1310_v60 = vpop.xlane.xlu1 %1309 }
 0x3c3   : > { %v1370_v3 = vmax.f32 %v1310_v60, 1e-12 }
 0x3c4   : > { %2638 = vrcp.f32 %v1367_v40 }
 0x3c5   : > { %2640 = vrcp.f32 %v1370_v3  ;;  %v1308_v56 = vpop.xlane.xlu0 %1307 }
 0x3c6   : > { %v1369_v17 = vmax.f32 %v1308_v56, 1e-12  ;;  %v1314_v13 = vpop.xlane.xlu1 %1313 }
 0x3c7   : > { %v1372_v49 = vmax.f32 %v1314_v13, 1e-12 }
 0x3c8   : > { %2642 = vrcp.f32 %v1369_v17 }
 0x3c9   : > { %2644 = vrcp.f32 %v1372_v49  ;;  %v1312_v11 = vpop.xlane.xlu0 %1311 }
 0x3ca   : > { %v1371_v19 = vmax.f32 %v1312_v11, 1e-12  ;;  %v1318_v53 = vpop.xlane.xlu1 %1317 }
 0x3cb   : > { %v2637_v15 = vpop.eup %2636  ;;  %v1374_v46 = vmax.f32 %v1318_v53, 1e-12 }
 0x3cc   : > { %2646 = vrcp.f32 %v1371_v19  ;;  %v1432_v59 = vmul.f32 %v2637_v15, %v3643_v4 }
 0x3cd   : > { %2648 = vrcp.f32 %v1374_v46  ;;  %v1316_v25 = vpop.xlane.xlu0 %1315 }
 0x3ce   : > { %v2639_v48 = vpop.eup %2638  ;;  %v1373_v10 = vmax.f32 %v1316_v25, 1e-12  ;;  %v1322_v54 = vpop.xlane.xlu1 %1321  ;;  %1737 = vst [vmem:[%s3947_s21 + $0x8] sm:$0xff] %v1432_v59 }
 0x3cf   : > { %v2641_v6 = vpop.eup %2640  ;;  %v1376_v7 = vmax.f32 %v1322_v54, 1e-12  ;;  %v1431_v35 = vmul.f32 %v2639_v48, %v3658_v36 }
 0x3d0   : > { %2650 = vrcp.f32 %v1373_v10  ;;  %v1434_v61 = vmul.f32 %v2641_v6, %v3661_v50 }
 0x3d1   : > { %2652 = vrcp.f32 %v1376_v7  ;;  %2192 = vmatprep.mubr.f32.mxu1 %v1431_v35  ;;  %1736 = vst [vmem:[%s3947_s21] sm:$0xff] %v1431_v35  ;;  %v1320_v4 = vpop.xlane.xlu0 %1319 }
 0x3d2   : > { %v2643_v43 = vpop.eup %2642  ;;  %v1375_v18 = vmax.f32 %v1320_v4, 1e-12  ;;  %2193 = vmatmul.mubr.f32.vlgmr.msra.gmra.mrb[0].mxu1 %v1432_v59  ;;  %1739 = vst [vmem:[%s3947_s21 + $0x18] sm:$0xff] %v1434_v61 }
 0x3d3   : > { %v2645_v21 = vpop.eup %2644  ;;  %v1433_v47 = vmul.f32 %v2643_v43, %v3674_v41  ;;  %v1326_v36 = vpop.xlane.xlu1 %1325 }
 0x3d4   : > { %2654 = vrcp.f32 %v1375_v18  ;;  %v1436_v23 = vmul.f32 %v2645_v21, %v3678_v33  ;;  %v1378_v24 = vmax.f32 %v1326_v36, 1e-12 }
 0x3d5   : > { %2195 = vmatprep.mubr.f32.mxu1 %v1433_v47  ;;  %1738 = vst [vmem:[%s3947_s21 + $0x10] sm:$0xff] %v1433_v47  ;;  %v1324_v26 = vpop.xlane.xlu0 %1323 }
 0x3d6   : > { %v2647_v50 = vpop.eup %2646  ;;  %2196 = vmatmul.mubr.f32.gmra.mrb[2].mxu1 %v1434_v61  ;;  %1741 = vst [vmem:[%s3947_s21 + $0x28] sm:$0xff] %v1436_v23  ;;  %v1377_v29 = vmax.f32 %v1324_v26, 1e-12  ;;  %2656 = vrcp.f32 %v1378_v24 }
 0x3d7   : > { %v2649_v2 = vpop.eup %2648  ;;  %v1435_v1 = vmul.f32 %v2647_v50, %v3690_v51 }
 0x3d8   : > { %v1438_v41 = vmul.f32 %v2649_v2, %v3699_v0  ;;  %2658 = vrcp.f32 %v1377_v29 }
 0x3d9   : > { %2198 = vmatprep.mubr.f32.mxu1 %v1435_v1  ;;  %1740 = vst [vmem:[%s3947_s21 + $0x20] sm:$0xff] %v1435_v1  ;;  %v1330_v63 = vpop.xlane.xlu1 %1329 }
 0x3da   : > { %v2651_v33 = vpop.eup %2650  ;;  %2199 = vmatmul.mubr.f32.gmra.mrb[4].mxu1 %v1436_v23  ;;  %1743 = vst [vmem:[%s3947_s21 + $0x38] sm:$0xff] %v1438_v41  ;;  %v1380_v60 = vmax.f32 %v1330_v63, 1e-12 }
 0x3db   : > { %v2653_v40 = vpop.eup %2652  ;;  %v1437_v3 = vmul.f32 %v2651_v33, %v3717_v14 }
 0x3dc   : > { %v1440_v56 = vmul.f32 %v2653_v40, %v3720_v55  ;;  %2660 = vrcp.f32 %v1380_v60  ;;  %v1328_v51 = vpop.xlane.xlu0 %1327 }
 0x3dd   : > { %2201 = vmatprep.mubr.f32.mxu1 %v1437_v3  ;;  %1742 = vst [vmem:[%s3947_s21 + $0x30] sm:$0xff] %v1437_v3  ;;  %v1379_v17 = vmax.f32 %v1328_v51, 1e-12  ;;  %v1334_v13 = vpop.xlane.xlu1 %1333 }
 0x3de   : > { %v2655_v0 = vpop.eup %2654  ;;  %2202 = vmatmul.mubr.f32.gmra.mrb[6].mxu1 %v1438_v41  ;;  %1745 = vst [vmem:[%s3947_s21 + $0x48] sm:$0xff] %v1440_v56  ;;  %v1382_v49 = vmax.f32 %v1334_v13, 1e-12 }
 0x3df   : > { %v1439_v11 = vmul.f32 %v2655_v0, %v3729_v20  ;;  %2662 = vrcp.f32 %v1379_v17 }
 0x3e0   : > { %2664 = vrcp.f32 %v1382_v49  ;;  %v1332_v14 = vpop.xlane.xlu0 %1331  ;;  %v2657_v55 = vpop.eup %2656 }
 0x3e1   : > { %2204 = vmatprep.mubr.f32.mxu1 %v1439_v11  ;;  %1744 = vst [vmem:[%s3947_s21 + $0x40] sm:$0xff] %v1439_v11  ;;  %v1381_v19 = vmax.f32 %v1332_v14, 1e-12  ;;  %v1442_v15 = vmul.f32 %v2657_v55, %v3745_v9 }
 0x3e2   : > { %2205 = vmatmul.mubr.f32.gmra.mrb[8].mxu1 %v1440_v56  ;;  %v2659_v53 = vpop.eup %2658 }
 0x3e3   : > { %2666 = vrcp.f32 %v1381_v19  ;;  %v1441_v46 = vmul.f32 %v2659_v53, %v3750_v30  ;;  %1747 = vst [vmem:[%s3947_s21 + $0x58] sm:$0xff] %v1442_v15 }
 0x3e4   : > { %v1338_v59 = vpop.xlane.xlu1 %1337 }
 0x3e5   : > { %v1384_v25 = vmax.f32 %v1338_v59, 1e-12  ;;  %v1336_v20 = vpop.xlane.xlu0 %1335  ;;  %2207 = vmatprep.mubr.f32.mxu1 %v1441_v46  ;;  %1746 = vst [vmem:[%s3947_s21 + $0x50] sm:$0xff] %v1441_v46 }
 0x3e6   : > { %v2661_v48 = vpop.eup %2660  ;;  %v1383_v10 = vmax.f32 %v1336_v20, 1e-12  ;;  %2208 = vmatmul.mubr.f32.gmra.mrb[10].mxu1 %v1442_v15 }
 0x3e7   : > { %2668 = vrcp.f32 %v1384_v25  ;;  %v1444_v54 = vmul.f32 %v2661_v48, %v3762_v31 }
 0x3e8   : > { %2670 = vrcp.f32 %v1383_v10  ;;  %v1342_v9 = vpop.xlane.xlu1 %1341 }
 0x3e9   : > { %v2663_v6 = vpop.eup %2662  ;;  %v1386_v7 = vmax.f32 %v1342_v9, 1e-12  ;;  %1749 = vst [vmem:[%s3947_s21 + $0x68] sm:$0xff] %v1444_v54 }
 0x3ea   : > { %v2665_v30 = vpop.eup %2664  ;;  %v1443_v35 = vmul.f32 %v2663_v6, %v3779_v58 }
 0x3eb   : > { %2672 = vrcp.f32 %v1386_v7  ;;  %v1446_v61 = vmul.f32 %v2665_v30, %v3787_v34 }
 0x3ec   : > { %v1340_v4 = vpop.xlane.xlu0 %1339  ;;  %2210 = vmatprep.mubr.f32.mxu1 %v1443_v35  ;;  %1748 = vst [vmem:[%s3947_s21 + $0x60] sm:$0xff] %v1443_v35 }
 0x3ed   : > { %v2667_v43 = vpop.eup %2666  ;;  %v1385_v18 = vmax.f32 %v1340_v4, 1e-12  ;;  %v1346_v21 = vpop.xlane.xlu1 %1345  ;;  %2211 = vmatmul.mubr.f32.gmra.mrb[12].mxu1 %v1444_v54  ;;  %1751 = vst [vmem:[%s3947_s21 + $0x78] sm:$0xff] %v1446_v61 }
 0x3ee   : > { %v1388_v31 = vmax.f32 %v1346_v21, 1e-12  ;;  %v1445_v47 = vmul.f32 %v2667_v43, %v3799_v27 }
 0x3ef   : > { %2674 = vrcp.f32 %v1385_v18 }
 0x3f0   : > { %2676 = vrcp.f32 %v1388_v31  ;;  %v1344_v23 = vpop.xlane.xlu0 %1343  ;;  %2213 = vmatprep.mubr.f32.mxu1 %v1445_v47  ;;  %1750 = vst [vmem:[%s3947_s21 + $0x70] sm:$0xff] %v1445_v47 }
 0x3f1   : > { %v2669_v58 = vpop.eup %2668  ;;  %v1387_v34 = vmax.f32 %v1344_v23, 1e-12  ;;  %2214 = vmatmul.mubr.f32.gmra.mrb[14].mxu1 %v1446_v61 }
 0x3f2   : > { %v2671_v36 = vpop.eup %2670  ;;  %v1350_v50 = vpop.xlane.xlu1 %1349  ;;  %v1448_v24 = vmul.f32 %v2669_v58, %v3820_v45 }
 0x3f3   : > { %2678 = vrcp.f32 %v1387_v34  ;;  %v1390_v26 = vmax.f32 %v1350_v50, 1e-12  ;;  %v1447_v2 = vmul.f32 %v2671_v36, %v3827_v5 }
 0x3f4   : > { %1753 = vst [vmem:[%s3947_s21 + $0x88] sm:$0xff] %v1448_v24 }
 0x3f5   : > { %v2673_v27 = vpop.eup %2672  ;;  %2680 = vrcp.f32 %v1390_v26  ;;  %v1348_v29 = vpop.xlane.xlu0 %1347  ;;  %2216 = vmatprep.mubr.f32.mxu1 %v1447_v2  ;;  %1752 = vst [vmem:[%s3947_s21 + $0x80] sm:$0xff] %v1447_v2 }
 0x3f6   : > { %v1389_v1 = vmax.f32 %v1348_v29, 1e-12  ;;  %v1354_v41 = vpop.xlane.xlu1 %1353  ;;  %2217 = vmatmul.mubr.f32.gmra.mrb[16].mxu1 %v1448_v24  ;;  %v1450_v33 = vmul.f32 %v2673_v27, %v3841_v28 }
 0x3f7   : > { %v1392_v63 = vmax.f32 %v1354_v41, 1e-12 }
 0x3f8   : > { %2682 = vrcp.f32 %v1389_v1  ;;  %1755 = vst [vmem:[%s3947_s21 + $0x98] sm:$0xff] %v1450_v33 }
 0x3f9   : > { %v2675_v45 = vpop.eup %2674  ;;  %2684 = vrcp.f32 %v1392_v63  ;;  %v1352_v40 = vpop.xlane.xlu0 %1351 }
 0x3fa   : > { %v2677_v5 = vpop.eup %2676  ;;  %v1391_v60 = vmax.f32 %v1352_v40, 1e-12  ;;  %v1358_v3 = vpop.xlane.xlu1 %1357  ;;  %v1449_v56 = vmul.f32 %v2675_v45, %v3861_v22 }
 0x3fb   : > { %v1394_v51 = vmax.f32 %v1358_v3, 1e-12  ;;  %v1452_v0 = vmul.f32 %v2677_v5, %v3870_v37 }
 0x3fc   : > { %2686 = vrcp.f32 %v1391_v60  ;;  %2219 = vmatprep.mubr.f32.mxu1 %v1449_v56  ;;  %1754 = vst [vmem:[%s3947_s21 + $0x90] sm:$0xff] %v1449_v56 }
 0x3fd   : > { %v2679_v28 = vpop.eup %2678  ;;  %2688 = vrcp.f32 %v1394_v51  ;;  %v1356_v17 = vpop.xlane.xlu0 %1355  ;;  %2220 = vmatmul.mubr.f32.gmra.mrb[18].mxu1 %v1450_v33  ;;  %1757 = vst [vmem:[%s3947_s21 + $0xa8] sm:$0xff] %v1452_v0 }
 0x3fe   : > { %v1393_v13 = vmax.f32 %v1356_v17, 1e-12  ;;  %v1362_v49 = vpop.xlane.xlu1 %1361  ;;  %v1451_v11 = vmul.f32 %v2679_v28, %v3876_v8 }
 0x3ff   : > { %v2681_v14 = vpop.eup %2680  ;;  %v1396_v55 = vmax.f32 %v1362_v49, 1e-12 }
 0x400   : > { %2690 = vrcp.f32 %v1393_v13  ;;  %2222 = vmatprep.mubr.f32.mxu1 %v1451_v11  ;;  %1756 = vst [vmem:[%s3947_s21 + $0xa0] sm:$0xff] %v1451_v11  ;;  %v1454_v22 = vmul.f32 %v2681_v14, %v3890_v16 }
 0x401   : > { %2692 = vrcp.f32 %v1396_v55  ;;  %v1360_v37 = vpop.xlane.xlu0 %1359  ;;  %2223 = vmatmul.mubr.f32.gmra.mrb[20].mxu1 %v1452_v0 }
 0x402   : > { %v2683_v19 = vpop.eup %2682  ;;  %v1395_v53 = vmax.f32 %v1360_v37, 1e-12  ;;  %1759 = vst [vmem:[%s3947_s21 + $0xb8] sm:$0xff] %v1454_v22 }
 0x403   : > { %v2685_v15 = vpop.eup %2684  ;;  %v1453_v46 = vmul.f32 %v2683_v19, %v3904_v44 }
 0x404   : > { %2694 = vrcp.f32 %v1395_v53  ;;  %v1366_v8 = vpop.xlane.xlu1 %1365  ;;  %v1456_v59 = vmul.f32 %v2685_v15, %v3907_v32 }
 0x405   : > { %v1398_v25 = vmax.f32 %v1366_v8, 1e-12  ;;  %2225 = vmatprep.mubr.f32.mxu1 %v1453_v46  ;;  %1758 = vst [vmem:[%s3947_s21 + $0xb0] sm:$0xff] %v1453_v46  ;;  %v1364_v16 = vpop.xlane.xlu0 %1363 }
 0x406   : > { %v2687_v20 = vpop.eup %2686  ;;  %v1397_v48 = vmax.f32 %v1364_v16, 1e-12  ;;  %2226 = vmatmul.mubr.f32.gmra.mrb[22].mxu1 %v1454_v22  ;;  %1761 = vst [vmem:[%s3947_s21 + $0xc8] sm:$0xff] %v1456_v59 }
 0x407   : > { %v2689_v10 = vpop.eup %2688  ;;  %2696 = vrcp.f32 %v1398_v25  ;;  %v1455_v44 = vmul.f32 %v2687_v20, %v3915_v38 }
 0x408   : > { %2698 = vrcp.f32 %v1397_v48  ;;  %v1458_v54 = vmul.f32 %v2689_v10, %v3919_v57 }
 0x409   : > { %2228 = vmatprep.mubr.f32.mxu1 %v1455_v44  ;;  %1760 = vst [vmem:[%s3947_s21 + $0xc0] sm:$0xff] %v1455_v44 }
 0x40a   : > { %v2691_v32 = vpop.eup %2690  ;;  %2229 = vmatmul.mubr.f32.gmra.mrb[24].mxu1 %v1456_v59  ;;  %1763 = vst [vmem:[%s3947_s21 + $0xd8] sm:$0xff] %v1458_v54 }
 0x40b   : > { %v2693_v9 = vpop.eup %2692  ;;  %v1457_v6 = vmul.f32 %v2691_v32, %v3925_v12 }
 0x40c   : > { %v1460_v7 = vmul.f32 %v2693_v9, %v3927_v52 }
 0x40d   : > { %2231 = vmatprep.mubr.f32.mxu1 %v1457_v6  ;;  %1762 = vst [vmem:[%s3947_s21 + $0xd0] sm:$0xff] %v1457_v6 }
 0x40e   : > { %v2695_v38 = vpop.eup %2694  ;;  %2232 = vmatmul.mubr.f32.gmra.mrb[26].mxu1 %v1458_v54  ;;  %1765 = vst [vmem:[%s3947_s21 + $0xe8] sm:$0xff] %v1460_v7 }
 0x40f   : > { %v1459_v57 = vmul.f32 %v2695_v38, %v3934_v62 }
 0x411   : > { %v2697_v30 = vpop.eup %2696  ;;  %2234 = vmatprep.mubr.f32.mxu1 %v1459_v57  ;;  %1764 = vst [vmem:[%s3947_s21 + $0xe0] sm:$0xff] %v1459_v57 }
 0x412   : > { %v2699_v35 = vpop.eup %2698  ;;  %2235 = vmatmul.mubr.f32.gmra.mrb[28].mxu1 %v1460_v7  ;;  %v1462_v12 = vmul.f32 %v2697_v30, %v3939_v42 }
 0x413   : > { %v1461_v52 = vmul.f32 %v2699_v35, %v3941_v39 }
 0x414   : > { %1767 = vst [vmem:[%s3947_s21 + $0xf8] sm:$0xff] %v1462_v12 }
 0x415   : > { %2237 = vmatprep.mubr.f32.mxu1 %v1461_v52  ;;  %1766 = vst [vmem:[%s3947_s21 + $0xf0] sm:$0xff] %v1461_v52 }
 0x416   : > { %2238 = vmatmul.mubr.f32.gmra.mrb[30].mxu1 %v1462_v12 }
 0x417   : > { %2799 = shalt.err (!%p2796_p1)
}
 0x418   : > { %s2800_s5 = scalar_lea.hbm %s4018_s30, 4096  ;;  %s2804_s24 = scalar_lea.hbm %s4144_s4, 8192 }
 0x419   : > { %p2801_p13 = scmp.ne.s32.totalorder %s4018_s30, %s2800_s5  ;;  %p2805_p4 = scmp.lt.u32.totalorder %s4018_s30, %s4144_s4 }
 0x41a   : > { %p2806_p5 = scmp.lt.u32.totalorder %s2804_s24, %s2800_s5  ;;  %p2808_p11 = scmp.lt.u32.totalorder %s2800_s5, %s4018_s30 }
 0x41b   : > { %p2802_p6 = pnand %p2801_p13, %p4158_p0 }
 0x41c   : > { %p2807_p8 = por %p2806_p5, %p2805_p4 }
 0x41d   : > { %p2803_p10 = pneg %p2802_p6 }
 0x41e   : > { %p2809_p2 = por %p2808_p11, %p2807_p8 }
 0x420   : > { %p2810_p3 = pnand %p2809_p2, %p2803_p10 }
 0x422   : > { %2813 = shalt.err (!%p2810_p3)
}
 0x423   : > { %s2896_s12 = smov 128   ;;  %s2897_s28 = smov 8  }
 0x424   : > { %2315 = dma.vmem_to_hbm [thread:$0]  (%p4158_p0), %s4021_s6, 4096, %s4018_s30, %s1774_s7, %s2896_s12, %s2896_s12, %s2897_s28  }
 0x425   : > { %s4051_s27 = scalar_lea.vmem [#allocation8], %s3108_s10  ;;  %s4089_s7 = scalar_lea.hbm %s4143_s3, %s1982_s23 }
 0x426   : > { %s1787_s10 = sshll.u32 %s4051_s27, 4  ;;  %s1769_s20 = scalar_lea.sflag [#allocation4], %s3105_s8  ;;  %s4091_s10 = int_to_ptr.vmem [resolvable:$true] %s1787_s10 }
 0x427   : > { %s2814_s29 = scalar_lea.vmem %s4091_s10, 4096  ;;  %s2898_s19 = smov [#allocation8]  }
 0x428   : > { %p2815_p7 = scmp.ne.s32.totalorder %s4091_s10, %s2814_s29  ;;  %s2818_s5 = sshll.u32 %s2898_s19, 4  ;;  %s2819_s5 = int_to_ptr.vmem [resolvable:$false] %s2818_s5 }
 0x429   : > { %s2820_s9 = scalar_lea.vmem %s2819_s5, 8192  ;;  %p2821_p1 = scmp.lt.s32.totalorder %s4091_s10, %s2819_s5 }
 0x42a   : > { %p2816_p9 = pnand %p2815_p7, %p4158_p0  ;;  %p2822_p13 = scmp.lt.s32.totalorder %s2820_s9, %s2814_s29 }
 0x42c   : > { %p2817_p12 = pneg %p2816_p9  ;;  %p2823_p6 = por %p2822_p13, %p2821_p1 }
 0x42e   : > { %p2824_p10 = pnand %p2823_p6, %p2817_p12 }
 0x4a5   : > { %v2194_v62 = vpop.f32.mrb[0].mxu1 }
 0x4a6   : > { %1705 = vst [vmem:[%s4051_s27 + $0x8] sm:$0xff] %v2194_v62  ;;  %v1545_v42 = vpop.f32.mrb[1].mxu1 }
 0x4a7   : > { %1704 = vst [vmem:[%s4051_s27] sm:$0xff] %v1545_v42 }
 0x4a9   : > { %v2197_v39 = vpop.f32.mrb[2].mxu1 }
 0x4aa   : > { %1707 = vst [vmem:[%s4051_s27 + $0x18] sm:$0xff] %v2197_v39  ;;  %v1555_v61 = vpop.f32.mrb[3].mxu1 }
 0x4ab   : > { %1706 = vst [vmem:[%s4051_s27 + $0x10] sm:$0xff] %v1555_v61 }
 0x4ad   : > { %v2200_v4 = vpop.f32.mrb[4].mxu1 }
 0x4ae   : > { %1709 = vst [vmem:[%s4051_s27 + $0x28] sm:$0xff] %v2200_v4  ;;  %v1565_v43 = vpop.f32.mrb[5].mxu1 }
 0x4af   : > { %1708 = vst [vmem:[%s4051_s27 + $0x20] sm:$0xff] %v1565_v43 }
 0x4b1   : > { %v2203_v18 = vpop.f32.mrb[6].mxu1 }
 0x4b2   : > { %1711 = vst [vmem:[%s4051_s27 + $0x38] sm:$0xff] %v2203_v18  ;;  %v1575_v21 = vpop.f32.mrb[7].mxu1 }
 0x4b3   : > { %1710 = vst [vmem:[%s4051_s27 + $0x30] sm:$0xff] %v1575_v21 }
 0x4b5   : > { %v2206_v31 = vpop.f32.mrb[8].mxu1 }
 0x4b6   : > { %1713 = vst [vmem:[%s4051_s27 + $0x48] sm:$0xff] %v2206_v31  ;;  %v1585_v47 = vpop.f32.mrb[9].mxu1 }
 0x4b7   : > { %1712 = vst [vmem:[%s4051_s27 + $0x40] sm:$0xff] %v1585_v47 }
 0x4b9   : > { %v2209_v23 = vpop.f32.mrb[10].mxu1 }
 0x4ba   : > { %1715 = vst [vmem:[%s4051_s27 + $0x58] sm:$0xff] %v2209_v23  ;;  %v1595_v58 = vpop.f32.mrb[11].mxu1 }
 0x4bb   : > { %1714 = vst [vmem:[%s4051_s27 + $0x50] sm:$0xff] %v1595_v58 }
 0x4c0   : > { %v2212_v34 = vpop.f32.mrb[12].mxu1 }
 0x4c1   : > { %1717 = vst [vmem:[%s4051_s27 + $0x68] sm:$0xff] %v2212_v34  ;;  %v1605_v36 = vpop.f32.mrb[13].mxu1 }
 0x4c2   : > { %1716 = vst [vmem:[%s4051_s27 + $0x60] sm:$0xff] %v1605_v36 }
 0x4c4   : > { %v2215_v50 = vpop.f32.mrb[14].mxu1 }
 0x4c5   : > { %1719 = vst [vmem:[%s4051_s27 + $0x78] sm:$0xff] %v2215_v50  ;;  %v1615_v24 = vpop.f32.mrb[15].mxu1 }
 0x4c6   : > { %1718 = vst [vmem:[%s4051_s27 + $0x70] sm:$0xff] %v1615_v24 }
 0x4c9   : > { %v2218_v26 = vpop.f32.mrb[16].mxu1 }
 0x4ca   : > { %1721 = vst [vmem:[%s4051_s27 + $0x88] sm:$0xff] %v2218_v26  ;;  %v1625_v2 = vpop.f32.mrb[17].mxu1 }
 0x4cb   : > { %1720 = vst [vmem:[%s4051_s27 + $0x80] sm:$0xff] %v1625_v2 }
 0x4d0   : > { %v2221_v27 = vpop.f32.mrb[18].mxu1 }
 0x4d1   : > { %1723 = vst [vmem:[%s4051_s27 + $0x98] sm:$0xff] %v2221_v27  ;;  %v1635_v29 = vpop.f32.mrb[19].mxu1 }
 0x4d2   : > { %1722 = vst [vmem:[%s4051_s27 + $0x90] sm:$0xff] %v1635_v29 }
 0x4d4   : > { %v2224_v1 = vpop.f32.mrb[20].mxu1 }
 0x4d5   : > { %1725 = vst [vmem:[%s4051_s27 + $0xa8] sm:$0xff] %v2224_v1  ;;  %v1645_v41 = vpop.f32.mrb[21].mxu1 }
 0x4d6   : > { %1724 = vst [vmem:[%s4051_s27 + $0xa0] sm:$0xff] %v1645_v41 }
 0x4d9   : > { %v2227_v33 = vpop.f32.mrb[22].mxu1 }
 0x4da   : > { %1727 = vst [vmem:[%s4051_s27 + $0xb8] sm:$0xff] %v2227_v33  ;;  %v1655_v63 = vpop.f32.mrb[23].mxu1 }
 0x4db   : > { %1726 = vst [vmem:[%s4051_s27 + $0xb0] sm:$0xff] %v1655_v63 }
 0x4dd   : > { %v2230_v45 = vpop.f32.mrb[24].mxu1 }
 0x4de   : > { %1729 = vst [vmem:[%s4051_s27 + $0xc8] sm:$0xff] %v2230_v45  ;;  %v1665_v40 = vpop.f32.mrb[25].mxu1 }
 0x4df   : > { %1728 = vst [vmem:[%s4051_s27 + $0xc0] sm:$0xff] %v1665_v40 }
 0x4e1   : > { %v2233_v5 = vpop.f32.mrb[26].mxu1 }
 0x4e2   : > { %1731 = vst [vmem:[%s4051_s27 + $0xd8] sm:$0xff] %v2233_v5  ;;  %v1675_v60 = vpop.f32.mrb[27].mxu1 }
 0x4e3   : > { %1730 = vst [vmem:[%s4051_s27 + $0xd0] sm:$0xff] %v1675_v60 }
 0x4e5   : > { %v2236_v3 = vpop.f32.mrb[28].mxu1 }
 0x4e6   : > { %1733 = vst [vmem:[%s4051_s27 + $0xe8] sm:$0xff] %v2236_v3  ;;  %v1685_v56 = vpop.f32.mrb[29].mxu1 }
 0x4e7   : > { %1732 = vst [vmem:[%s4051_s27 + $0xe0] sm:$0xff] %v1685_v56 }
 0x4e9   : > { %v2239_v51 = vpop.f32.mrb[30].mxu1 }
 0x4ea   : > { %1735 = vst [vmem:[%s4051_s27 + $0xf8] sm:$0xff] %v2239_v51  ;;  %v1695_v0 = vpop.f32.mrb[31].mxu1 }
 0x4eb   : > { %1734 = vst [vmem:[%s4051_s27 + $0xf0] sm:$0xff] %v1695_v0 }
 0x4ec   : > { %2827 = shalt.err (!%p2824_p10)
}
 0x4ed   : > { %s2828_s23 = scalar_lea.hbm %s4089_s7, 4096  ;;  %s2832_s21 = scalar_lea.hbm %s4143_s3, 8192 }
 0x4ee   : > { %p2829_p4 = scmp.ne.s32.totalorder %s4089_s7, %s2828_s23  ;;  %p2833_p11 = scmp.lt.u32.totalorder %s4089_s7, %s4143_s3 }
 0x4ef   : > { %p2834_p2 = scmp.lt.u32.totalorder %s2832_s21, %s2828_s23  ;;  %p2836_p7 = scmp.lt.u32.totalorder %s2828_s23, %s4089_s7 }
 0x4f0   : > { %p2830_p5 = pnand %p2829_p4, %p4158_p0 }
 0x4f1   : > { %p2835_p3 = por %p2834_p2, %p2833_p11 }
 0x4f2   : > { %p2831_p8 = pneg %p2830_p5 }
 0x4f3   : > { %p2837_p9 = por %p2836_p7, %p2835_p3 }
 0x4f5   : > { %p2838_p12 = pnand %p2837_p9, %p2831_p8 }
 0x4f7   : > { %2841 = shalt.err (!%p2838_p12)
}
 0x4f8   : > { %2314 = dma.vmem_to_hbm [thread:$0]  (%p4158_p0), %s4091_s10, 4096, %s4089_s7, %s1769_s20, %s2896_s12, %s2896_s12, %s2897_s28  }
 0x4f9 PF: > { %s1818_s30 = sand.u32 1, %s2876_s15   ;;  %p4159_p1 = scmp.ne.s32.totalorder %s4149_s22, 0 }
 0x4fa   : > { %p4160_p13 = scmp.ge.s32.totalorder %s2888_s18, 2  ;;  %s1819_s6 = scalar_lea.sflag [#allocation4], %s1818_s30 }
 0x4fc   : > { %p2330_p6 = pnand %p4160_p13, %p4159_p1 }
 0x4fe   : > { %2867 = dma.done.wait (!%p2330_p6), %s1819_s6, 4096  }
 0x4ff   : > { %2869 = vsyncadd (!%p2330_p6), %s1819_s6, 4294963200  ;;  %s1828_s13 = scalar_lea.sflag [#allocation10], %s1818_s30 }
 0x500   : > { %2871 = dma.done.wait (!%p2330_p6), %s1828_s13, 4096  }
 0x501   : > { %2873 = vsyncadd (!%p2330_p6), %s1828_s13, 4294963200  ;;  %p22_p0 = scmp.ge.s32.totalorder %s3040_s26, 4   ;;  %s4161_s15 = smov %s2880_s16 }
 0x502   : > { %s4162_s16 = smov %s2884_s17  ;;  %s4163_s17 = smov %s3056_s14 }
 0x503   : > { %s4164_s18 = smov %s3040_s26  ;;  %24 = sbr.rel (!%p22_p0) target bundleno = 8 (0x8), region = 102 }
 0x50a   :  { %1833 = vsyncpa [#allocation3], 1 }
 0x50b   :  { %1835 = vsyncpa [#allocation3 + $0x1], 1 }
 0x50c   :  { %1836 = vsyncpa [#allocation6], 1 }
 0x50d   :  { %1837 = vsyncpa [#allocation4], 1 }
 0x50e   :  { %1839 = vsyncpa [#allocation4 + $0x1], 1 }
 0x50f   :  { %1840 = vsyncpa [#allocation10], 1 }
 0x510   :  { %1842 = vsyncpa [#allocation10 + $0x1], 1 }

</bundles_post_ra>
